<compile_context>
chip_gen: v7x
topology: tpu7x:2x2x1
jax: 0.10.0
libtpu: 0.0.40
codegen_flags: <defaults>
</compile_context>

<pallas_src>
import functools

import jax
import jax.numpy as jnp
from jax.experimental import pallas as pl
from jax.experimental.pallas import tpu as pltpu


def _round_up(x, m):
    return (x + m - 1) // m * m


def _mlp_kernel(x_ref, w_ref, b_ref, o_ref, *, matmul_dtype):
    """Full MLP forward for one batch tile. All matmuls on the MXU.

    x_ref : (tile, P)        f32   batch tile (lane-padded)
    w_ref : (L, P, P)        matmul_dtype   stacked, zero-padded weights (in, out)
    b_ref : (L, 1, P)        f32   stacked, zero-padded biases
    o_ref : (tile, P)        f32   lane-dense output tile
    """
    n_layers = w_ref.shape[0]
    h = x_ref[...]                                     # (tile, P) f32

    for l in range(n_layers):                          # static unroll (8 layers)
        y = jnp.dot(h.astype(matmul_dtype), w_ref[l],
                    preferred_element_type=jnp.float32)
        y = y + b_ref[l]                               # (1, P) broadcast, f32
        if l < n_layers - 1:
            h = jnp.maximum(y, 0.0)                    # ReLU in f32
        else:
            h = y                                      # final layer: no activation

    o_ref[...] = h.astype(o_ref.dtype)


def mlp_forward(x, params, *, batch_tile=None, matmul_dtype=jnp.bfloat16):
    """x: (B, n_feature) float32.  params: list of (W, b), W is (in, out), b is (1, out)."""
    B, n_feature = x.shape
    n_layers = len(params)
    n_output = params[-1][0].shape[1]

    # Common lane-padded width for every layer (all dims here are <= 128).
    dims = [n_feature] + [w.shape[1] for (w, _) in params]
    P = _round_up(max(dims), 128)

    # Batch tile: fill the MXU M dimension, stay a multiple of 8, keep >= 2
    # grid steps when the batch allows (v7x: 2 TensorCores share the grid).
    if batch_tile is None:
        half = max(8, _round_up(B, 8) // 2)
        batch_tile = min(256, _round_up(half, 8))
    assert batch_tile % 8 == 0, "batch_tile must be a multiple of 8"

    B_pad = _round_up(B, batch_tile)

    # Zero-pad input rows/lanes; zeros propagate as zeros through all layers.
    x_p = jnp.zeros((B_pad, P), jnp.float32).at[:B, :n_feature].set(
        x.astype(jnp.float32))

    # Zero-pad and stack weights/biases into single resident blocks.
    w_list, b_list = [], []
    for (w, b) in params:
        fi, fo = w.shape
        w_list.append(jnp.zeros((P, P), jnp.float32).at[:fi, :fo].set(w))
        b2 = b.reshape(1, -1)
        b_list.append(jnp.zeros((1, P), jnp.float32).at[:, :b2.shape[1]].set(b2))
    w_stack = jnp.stack(w_list).astype(matmul_dtype)   # (L, P, P)
    b_stack = jnp.stack(b_list)                        # (L, 1, P) f32

    grid = (B_pad // batch_tile,)
    kernel = functools.partial(_mlp_kernel, matmul_dtype=matmul_dtype)

    out_full = pl.pallas_call(
        kernel,
        out_shape=jax.ShapeDtypeStruct((B_pad, P), jnp.float32),
        grid_spec=pltpu.PrefetchScalarGridSpec(
            num_scalar_prefetch=0,
            grid=grid,
            in_specs=[
                pl.BlockSpec((batch_tile, P), lambda i: (i, 0)),
                pl.BlockSpec((n_layers, P, P), lambda i: (0, 0, 0)),
                pl.BlockSpec((n_layers, 1, P), lambda i: (0, 0, 0)),
            ],
            out_specs=pl.BlockSpec((batch_tile, P), lambda i: (i, 0)),
        ),
        compiler_params=pltpu.CompilerParams(
            dimension_semantics=("parallel",)),
    )(x_p, w_stack, b_stack)

    # Strip batch and lane padding.
    return out_full[:B, :n_output]


def init_params(key, n_feature, n_hid1, n_hid2, n_output):
    """PyTorch-like nn.Linear init (uniform +/- 1/sqrt(fan_in)).
    Weights returned as (in_features, out_features) == PyTorch weight.T."""
    dims = [
        (n_feature, n_hid1),  # hidden
        (n_hid1, n_hid1),     # inner1
        (n_hid1, n_hid1),     # inner2
        (n_hid1, n_hid2),     # inner3
        (n_hid2, n_hid2),     # inner4
        (n_hid2, n_hid2),     # inner5
        (n_hid2, n_hid2),     # inner6
        (n_hid2, n_output),   # out
    ]
    params = []
    for (fan_in, fan_out) in dims:
        key, kw, kb = jax.random.split(key, 3)
        bound = 1.0 / (fan_in ** 0.5)
        w = jax.random.uniform(kw, (fan_in, fan_out), jnp.float32,
                               minval=-bound, maxval=bound)
        b = jax.random.uniform(kb, (1, fan_out), jnp.float32,
                               minval=-bound, maxval=bound)
        params.append((w, b))
    return params


def mlp_reference(x, params):
    h = x
    for (w, b) in params[:-1]:
        h = jnp.maximum(h @ w + b, 0.0)
    w, b = params[-1]
    return h @ w + b


if __name__ == "__main__":
    key = jax.random.PRNGKey(0)
    key, kx = jax.random.split(key)

    # Shapes consistent with the module: n_feature=16, n_hid1=n_hid2=32,
    # n_output=4.  Batch 1024 so the 256-row tile yields a 4-step parallel grid.
    batch, n_feature, n_hid1, n_hid2, n_output = 1024, 16, 32, 32, 4
    x = jax.random.normal(kx, (batch, n_feature), jnp.float32)

    # Input standardization from the script preamble: (x - mean) / std over axis 0.
    x = (x - x.mean(axis=0)) / x.std(axis=0)

    params = init_params(key, n_feature, n_hid1, n_hid2, n_output)
    ref = mlp_reference(x, params)

    # Exact path: f32 matmul operands.
    out_f32 = jax.block_until_ready(
        mlp_forward(x, params, matmul_dtype=jnp.float32))
    assert out_f32.shape == (batch, n_output)
    assert jnp.allclose(out_f32, ref, atol=1e-3, rtol=1e-3), "f32 mismatch vs reference"

    # Default perf path: bf16 MXU operands, f32 accumulation / bias / ReLU.
    out_bf16 = jax.block_until_ready(mlp_forward(x, params))
    assert out_bf16.shape == (batch, n_output)
    assert bool(jnp.all(jnp.isfinite(out_bf16)))
    assert jnp.allclose(out_bf16, ref, atol=5e-2, rtol=5e-2), "bf16 mismatch vs reference"

    print("KERNEL_OK")
</pallas_src>

<mosaic_0001>
module attributes {stable_mosaic.version = 11 : i64} {
  func.func @_mlp_kernel(%arg0: i32, %arg1: memref<256x128xf32, #tpu.memory_space<vmem>>, %arg2: memref<8x128x128xf32, #tpu.memory_space<vmem>>, %arg3: memref<8x1x128xf32, #tpu.memory_space<vmem>>, %arg4: memref<256x128xf32, #tpu.memory_space<vmem>>) attributes {dimension_semantics = [#tpu.dimension_semantics<parallel>], iteration_bounds = array<i64: 4>, scalar_prefetch = 0 : i64, scratch_operands = 0 : i64, tpu.core_type = #tpu.core_type<tc>, window_params = [{transform_indices = @transform_0, window_bounds = array<i64: 256, 128>}, {pipeline_mode = #tpu.pipeline_mode<synchronous>, transform_indices = @transform_1, window_bounds = array<i64: 8, 128, 128>}, {pipeline_mode = #tpu.pipeline_mode<synchronous>, transform_indices = @transform_2, window_bounds = array<i64: 8, 1, 128>}, {transform_indices = @transform_3, window_bounds = array<i64: 256, 128>}]} {
    %c0 = arith.constant 0 : index
    %c0_0 = arith.constant 0 : index
    %0 = vector.load %arg1[%c0, %c0_0] : memref<256x128xf32, #tpu.memory_space<vmem>>, vector<256x128xf32>
    %c0_1 = arith.constant 0 : index
    %c0_2 = arith.constant 0 : index
    %c0_3 = arith.constant 0 : index
    %1 = vector.load %arg2[%c0_1, %c0_2, %c0_3] : memref<8x128x128xf32, #tpu.memory_space<vmem>>, vector<1x128x128xf32>
    %2 = vector.shape_cast %1 : vector<1x128x128xf32> to vector<128x128xf32>
    %cst = arith.constant dense<0.000000e+00> : vector<256x128xf32>
    %3 = tpu.matmul %0, %2, %cst {dimension_numbers = #tpu.dot_dimension_numbers<[1], [0], [0], [1], [0, 0, 1, 1], [], []>} : vector<256x128xf32>, vector<128x128xf32>, vector<256x128xf32> -> vector<256x128xf32>
    %c0_4 = arith.constant 0 : index
    %c0_5 = arith.constant 0 : index
    %c0_6 = arith.constant 0 : index
    %4 = vector.load %arg3[%c0_4, %c0_5, %c0_6] : memref<8x1x128xf32, #tpu.memory_space<vmem>>, vector<1x1x128xf32>
    %5 = vector.shape_cast %4 : vector<1x1x128xf32> to vector<1x128xf32>
    %6 = vector.broadcast %5 : vector<1x128xf32> to vector<256x128xf32>
    %7 = arith.addf %3, %6 : vector<256x128xf32>
    %cst_7 = arith.constant 0.000000e+00 : f32
    %8 = vector.broadcast %cst_7 : f32 to vector<256x128xf32>
    %9 = arith.maximumf %7, %8 : vector<256x128xf32>
    %c1 = arith.constant 1 : index
    %c0_8 = arith.constant 0 : index
    %c0_9 = arith.constant 0 : index
    %10 = vector.load %arg2[%c1, %c0_8, %c0_9] : memref<8x128x128xf32, #tpu.memory_space<vmem>>, vector<1x128x128xf32>
    %11 = vector.shape_cast %10 : vector<1x128x128xf32> to vector<128x128xf32>
    %cst_10 = arith.constant dense<0.000000e+00> : vector<256x128xf32>
    %12 = tpu.matmul %9, %11, %cst_10 {dimension_numbers = #tpu.dot_dimension_numbers<[1], [0], [0], [1], [0, 0, 1, 1], [], []>} : vector<256x128xf32>, vector<128x128xf32>, vector<256x128xf32> -> vector<256x128xf32>
    %c1_11 = arith.constant 1 : index
    %c0_12 = arith.constant 0 : index
    %c0_13 = arith.constant 0 : index
    %13 = vector.load %arg3[%c1_11, %c0_12, %c0_13] : memref<8x1x128xf32, #tpu.memory_space<vmem>>, vector<1x1x128xf32>
    %14 = vector.shape_cast %13 : vector<1x1x128xf32> to vector<1x128xf32>
    %15 = vector.broadcast %14 : vector<1x128xf32> to vector<256x128xf32>
    %16 = arith.addf %12, %15 : vector<256x128xf32>
    %cst_14 = arith.constant 0.000000e+00 : f32
    %17 = vector.broadcast %cst_14 : f32 to vector<256x128xf32>
    %18 = arith.maximumf %16, %17 : vector<256x128xf32>
    %c2 = arith.constant 2 : index
    %c0_15 = arith.constant 0 : index
    %c0_16 = arith.constant 0 : index
    %19 = vector.load %arg2[%c2, %c0_15, %c0_16] : memref<8x128x128xf32, #tpu.memory_space<vmem>>, vector<1x128x128xf32>
    %20 = vector.shape_cast %19 : vector<1x128x128xf32> to vector<128x128xf32>
    %cst_17 = arith.constant dense<0.000000e+00> : vector<256x128xf32>
    %21 = tpu.matmul %18, %20, %cst_17 {dimension_numbers = #tpu.dot_dimension_numbers<[1], [0], [0], [1], [0, 0, 1, 1], [], []>} : vector<256x128xf32>, vector<128x128xf32>, vector<256x128xf32> -> vector<256x128xf32>
    %c2_18 = arith.constant 2 : index
    %c0_19 = arith.constant 0 : index
    %c0_20 = arith.constant 0 : index
    %22 = vector.load %arg3[%c2_18, %c0_19, %c0_20] : memref<8x1x128xf32, #tpu.memory_space<vmem>>, vector<1x1x128xf32>
    %23 = vector.shape_cast %22 : vector<1x1x128xf32> to vector<1x128xf32>
    %24 = vector.broadcast %23 : vector<1x128xf32> to vector<256x128xf32>
    %25 = arith.addf %21, %24 : vector<256x128xf32>
    %cst_21 = arith.constant 0.000000e+00 : f32
    %26 = vector.broadcast %cst_21 : f32 to vector<256x128xf32>
    %27 = arith.maximumf %25, %26 : vector<256x128xf32>
    %c3 = arith.constant 3 : index
    %c0_22 = arith.constant 0 : index
    %c0_23 = arith.constant 0 : index
    %28 = vector.load %arg2[%c3, %c0_22, %c0_23] : memref<8x128x128xf32, #tpu.memory_space<vmem>>, vector<1x128x128xf32>
    %29 = vector.shape_cast %28 : vector<1x128x128xf32> to vector<128x128xf32>
    %cst_24 = arith.constant dense<0.000000e+00> : vector<256x128xf32>
    %30 = tpu.matmul %27, %29, %cst_24 {dimension_numbers = #tpu.dot_dimension_numbers<[1], [0], [0], [1], [0, 0, 1, 1], [], []>} : vector<256x128xf32>, vector<128x128xf32>, vector<256x128xf32> -> vector<256x128xf32>
    %c3_25 = arith.constant 3 : index
    %c0_26 = arith.constant 0 : index
    %c0_27 = arith.constant 0 : index
    %31 = vector.load %arg3[%c3_25, %c0_26, %c0_27] : memref<8x1x128xf32, #tpu.memory_space<vmem>>, vector<1x1x128xf32>
    %32 = vector.shape_cast %31 : vector<1x1x128xf32> to vector<1x128xf32>
    %33 = vector.broadcast %32 : vector<1x128xf32> to vector<256x128xf32>
    %34 = arith.addf %30, %33 : vector<256x128xf32>
    %cst_28 = arith.constant 0.000000e+00 : f32
    %35 = vector.broadcast %cst_28 : f32 to vector<256x128xf32>
    %36 = arith.maximumf %34, %35 : vector<256x128xf32>
    %c4 = arith.constant 4 : index
    %c0_29 = arith.constant 0 : index
    %c0_30 = arith.constant 0 : index
    %37 = vector.load %arg2[%c4, %c0_29, %c0_30] : memref<8x128x128xf32, #tpu.memory_space<vmem>>, vector<1x128x128xf32>
    %38 = vector.shape_cast %37 : vector<1x128x128xf32> to vector<128x128xf32>
    %cst_31 = arith.constant dense<0.000000e+00> : vector<256x128xf32>
    %39 = tpu.matmul %36, %38, %cst_31 {dimension_numbers = #tpu.dot_dimension_numbers<[1], [0], [0], [1], [0, 0, 1, 1], [], []>} : vector<256x128xf32>, vector<128x128xf32>, vector<256x128xf32> -> vector<256x128xf32>
    %c4_32 = arith.constant 4 : index
    %c0_33 = arith.constant 0 : index
    %c0_34 = arith.constant 0 : index
    %40 = vector.load %arg3[%c4_32, %c0_33, %c0_34] : memref<8x1x128xf32, #tpu.memory_space<vmem>>, vector<1x1x128xf32>
    %41 = vector.shape_cast %40 : vector<1x1x128xf32> to vector<1x128xf32>
    %42 = vector.broadcast %41 : vector<1x128xf32> to vector<256x128xf32>
    %43 = arith.addf %39, %42 : vector<256x128xf32>
    %cst_35 = arith.constant 0.000000e+00 : f32
    %44 = vector.broadcast %cst_35 : f32 to vector<256x128xf32>
    %45 = arith.maximumf %43, %44 : vector<256x128xf32>
    %c5 = arith.constant 5 : index
    %c0_36 = arith.constant 0 : index
    %c0_37 = arith.constant 0 : index
    %46 = vector.load %arg2[%c5, %c0_36, %c0_37] : memref<8x128x128xf32, #tpu.memory_space<vmem>>, vector<1x128x128xf32>
    %47 = vector.shape_cast %46 : vector<1x128x128xf32> to vector<128x128xf32>
    %cst_38 = arith.constant dense<0.000000e+00> : vector<256x128xf32>
    %48 = tpu.matmul %45, %47, %cst_38 {dimension_numbers = #tpu.dot_dimension_numbers<[1], [0], [0], [1], [0, 0, 1, 1], [], []>} : vector<256x128xf32>, vector<128x128xf32>, vector<256x128xf32> -> vector<256x128xf32>
    %c5_39 = arith.constant 5 : index
    %c0_40 = arith.constant 0 : index
    %c0_41 = arith.constant 0 : index
    %49 = vector.load %arg3[%c5_39, %c0_40, %c0_41] : memref<8x1x128xf32, #tpu.memory_space<vmem>>, vector<1x1x128xf32>
    %50 = vector.shape_cast %49 : vector<1x1x128xf32> to vector<1x128xf32>
    %51 = vector.broadcast %50 : vector<1x128xf32> to vector<256x128xf32>
    %52 = arith.addf %48, %51 : vector<256x128xf32>
    %cst_42 = arith.constant 0.000000e+00 : f32
    %53 = vector.broadcast %cst_42 : f32 to vector<256x128xf32>
    %54 = arith.maximumf %52, %53 : vector<256x128xf32>
    %c6 = arith.constant 6 : index
    %c0_43 = arith.constant 0 : index
    %c0_44 = arith.constant 0 : index
    %55 = vector.load %arg2[%c6, %c0_43, %c0_44] : memref<8x128x128xf32, #tpu.memory_space<vmem>>, vector<1x128x128xf32>
    %56 = vector.shape_cast %55 : vector<1x128x128xf32> to vector<128x128xf32>
    %cst_45 = arith.constant dense<0.000000e+00> : vector<256x128xf32>
    %57 = tpu.matmul %54, %56, %cst_45 {dimension_numbers = #tpu.dot_dimension_numbers<[1], [0], [0], [1], [0, 0, 1, 1], [], []>} : vector<256x128xf32>, vector<128x128xf32>, vector<256x128xf32> -> vector<256x128xf32>
    %c6_46 = arith.constant 6 : index
    %c0_47 = arith.constant 0 : index
    %c0_48 = arith.constant 0 : index
    %58 = vector.load %arg3[%c6_46, %c0_47, %c0_48] : memref<8x1x128xf32, #tpu.memory_space<vmem>>, vector<1x1x128xf32>
    %59 = vector.shape_cast %58 : vector<1x1x128xf32> to vector<1x128xf32>
    %60 = vector.broadcast %59 : vector<1x128xf32> to vector<256x128xf32>
    %61 = arith.addf %57, %60 : vector<256x128xf32>
    %cst_49 = arith.constant 0.000000e+00 : f32
    %62 = vector.broadcast %cst_49 : f32 to vector<256x128xf32>
    %63 = arith.maximumf %61, %62 : vector<256x128xf32>
    %c7 = arith.constant 7 : index
    %c0_50 = arith.constant 0 : index
    %c0_51 = arith.constant 0 : index
    %64 = vector.load %arg2[%c7, %c0_50, %c0_51] : memref<8x128x128xf32, #tpu.memory_space<vmem>>, vector<1x128x128xf32>
    %65 = vector.shape_cast %64 : vector<1x128x128xf32> to vector<128x128xf32>
    %cst_52 = arith.constant dense<0.000000e+00> : vector<256x128xf32>
    %66 = tpu.matmul %63, %65, %cst_52 {dimension_numbers = #tpu.dot_dimension_numbers<[1], [0], [0], [1], [0, 0, 1, 1], [], []>} : vector<256x128xf32>, vector<128x128xf32>, vector<256x128xf32> -> vector<256x128xf32>
    %c7_53 = arith.constant 7 : index
    %c0_54 = arith.constant 0 : index
    %c0_55 = arith.constant 0 : index
    %67 = vector.load %arg3[%c7_53, %c0_54, %c0_55] : memref<8x1x128xf32, #tpu.memory_space<vmem>>, vector<1x1x128xf32>
    %68 = vector.shape_cast %67 : vector<1x1x128xf32> to vector<1x128xf32>
    %69 = vector.broadcast %68 : vector<1x128xf32> to vector<256x128xf32>
    %70 = arith.addf %66, %69 : vector<256x128xf32>
    %c0_56 = arith.constant 0 : index
    %c0_57 = arith.constant 0 : index
    %71 = vector.load %arg4[%c0_56, %c0_57] : memref<256x128xf32, #tpu.memory_space<vmem>>, vector<256x128xf32>
    tpu.vector_store %arg4[%c0_56, %c0_57], %70 {strides = array<i32>} : memref<256x128xf32, #tpu.memory_space<vmem>>, vector<256x128xf32>,
    return
  }
  func.func @transform_0(%arg0: i32) -> (i32, i32) {
    %c0_i32 = arith.constant 0 : i32
    %c0_i32_0 = arith.constant 0 : i32
    return %arg0, %c0_i32 : i32, i32
  }
  func.func @transform_1(%arg0: i32) -> (i32, i32, i32) {
    %c0_i32 = arith.constant 0 : i32
    %c0_i32_0 = arith.constant 0 : i32
    %c0_i32_1 = arith.constant 0 : i32
    %c0_i32_2 = arith.constant 0 : i32
    return %c0_i32, %c0_i32_0, %c0_i32_1 : i32, i32, i32
  }
  func.func @transform_2(%arg0: i32) -> (i32, i32, i32) {
    %c0_i32 = arith.constant 0 : i32
    %c0_i32_0 = arith.constant 0 : i32
    %c0_i32_1 = arith.constant 0 : i32
    %c0_i32_2 = arith.constant 0 : i32
    return %c0_i32, %c0_i32_0, %c0_i32_1 : i32, i32, i32
  }
  func.func @transform_3(%arg0: i32) -> (i32, i32) {
    %c0_i32 = arith.constant 0 : i32
    %c0_i32_0 = arith.constant 0 : i32
    return %arg0, %c0_i32 : i32, i32
  }
}

</mosaic_0001>

<bundles_post_ra>
// kernel: tpu_custom_call.1
= control target key start
LH: loop header
LB: loop body
LE: loop exit
PB: predicated region body
PF: predicated region fallthrough
CT: control target
= control target key end

     0   :  { %8 = vsyncpa [#allocation3], 0  ;;  %s4757_s0 = inlined_call_operand.hbm [shape: f32[1024,128], index: 0, kind: input, shape index: {}]   ;;  %s4758_s1 = inlined_call_operand.hbm [shape: f32[8,128,128], index: 1, kind: input, shape index: {}]   ;;  %s4759_s2 = inlined_call_operand.hbm [shape: f32[8,1,128], index: 2, kind: input, shape index: {}]   ;;  %s4760_s3 = inlined_call_operand.hbm [shape: f32[1024,128], index: 3, kind: output, shape index: {}]  }
   0x1   :  { %10 = vsyncpa [#allocation3 + $0x1], 0 }
   0x2   :  { %11 = vsyncpa [#allocation6], 0 }
   0x3   :  { %12 = vsyncpa [#allocation4], 0 }
   0x4   :  { %14 = vsyncpa [#allocation4 + $0x1], 0  ;;  %s4181_s12 = smov 0   ;;  %s4183_s13 = smov 0  }
   0x5   :  { %s4185_s14 = smov 0   ;;  %s4187_s15 = smov 0  }
   0x6 LB: > { %s4202_s16 = sadd.s32 4294967295, %s4149_s15   ;;  %s2612_s17 = sadd.s32 4294967294, %s4149_s15   ;;  %s4149_s15 = sphi %s4187_s15, %s4779_s15   ;;  %s4145_s14 = sphi %s4185_s14, %s4778_s14   ;;  %s4141_s13 = sphi %s4183_s13, %s4777_s13   ;;  %s4137_s12 = sphi %s4181_s12, %s4776_s12  }
   0x7   : > { %p40_p0 = scmp.ne.s32.totalorder %s4141_s13, %s4137_s12  ;;  %p4761_p1 = scmp.eq.s32.totalorder %s4202_s16, 0 }
   0x8   : > { %p112_p3 = scmp.eq.s32.totalorder %s2612_s17, 3  ;;  %p2613_p5 = scmp.ge.s32.totalorder %s4149_s15, 1 }
   0x9   : > { %p4211_p4 = por %p4761_p1, %p40_p0  ;;  %p119_p7 = scmp.lt.s32.totalorder %s4149_s15, 5 }
   0xa   : > { %p4216_p6 = por %p112_p3, %p40_p0  ;;  %s4151_s21 = smov [#allocation5]  }
   0xb   : > { %s4764_s18 = scalar_select %p4211_p4, 1, 0 }
   0xc   : > { %s4765_s19 = scalar_select %p4216_p6, 1, 0 }
   0xd   : > { %p4221_p8 = pnand %p2613_p5, %p119_p7  ;;  %s131_s22 = sshll.u32 %s4151_s21, 4  ;;  %s132_s22 = int_to_ptr.vmem [resolvable:$true] %s131_s22 }
   0xe   : > { %s4152_s24 = smov [#allocation7]   ;;  %s3993_s28 = scalar_lea.hbm %s4758_s1, 16384 }
   0xf   : > { %s4766_s20 = scalar_select %p4221_p8, 1, 0 }
  0x10   : > { %p3932_p9 = pneg %p4221_p8  ;;  %s144_s25 = sshll.u32 %s4152_s24, 4  ;;  %s4233_s25 = int_to_ptr.vmem [resolvable:$true] %s144_s25 }
  0x11   : > { %p3994_p11 = scmp.ne.s32.totalorder %s4758_s1, %s3993_s28  ;;  %p4000_p3 = scmp.lt.u32.totalorder %s3993_s28, %s4758_s1 }
  0x12   : > { %p4229_p10 = pnand %p3932_p9, %p4761_p1 }
  0x14   : > { %p3995_p12 = pneg %p4229_p10 }
  0x16   : > { %p3996_p13 = pnand %p3995_p12, %p3994_p11 }
  0x18   : > { %p3997_p0 = pneg %p3996_p13 }
  0x1a   : > { %p4002_p5 = pnand %p4000_p3, %p3997_p0 }
  0x1c   : > { %4005 = shalt.err (!%p4002_p5)
}
  0x1d   : > { %s4006_s6 = scalar_lea.vmem %s132_s22, 16384  ;;  %p4014_p2 = scmp.lt.s32.totalorder %s132_s22, %s132_s22 }
  0x1e   : > { %p4007_p7 = scmp.ne.s32.totalorder %s132_s22, %s4006_s6  ;;  %p4015_p6 = scmp.lt.s32.totalorder %s4006_s6, %s4006_s6 }
  0x20   : > { %p4009_p9 = pnand %p4007_p7, %p3995_p12  ;;  %p4016_p4 = por %p4015_p6, %p4014_p2 }
  0x22   : > { %p4010_p1 = pneg %p4009_p9 }
  0x24   : > { %p4017_p8 = pnand %p4016_p4, %p4010_p1 }
  0x26   : > { %4020 = shalt.err (!%p4017_p8)
}
  0x27   : > { %s4153_s7 = smov 128   ;;  %s4154_s8 = smov 8  }
  0x28   : > { %3935 = dma.hbm_to_vmem [thread:$0]  (!%p4229_p10), %s4758_s1, 16384, %s132_s22, [#allocation6], %s4153_s7, %s4153_s7, %s4154_s8  }
  0x29   : > { %s4021_s21 = scalar_lea.hbm %s4759_s2, 128 }
  0x2a   : > { %p4022_p1 = scmp.ne.s32.totalorder %s4759_s2, %s4021_s21  ;;  %p4028_p6 = scmp.lt.u32.totalorder %s4021_s21, %s4759_s2 }
  0x2c   : > { %p4024_p2 = pnand %p4022_p1, %p3995_p12 }
  0x2e   : > { %p4025_p4 = pneg %p4024_p2 }
  0x30   : > { %p4030_p8 = pnand %p4028_p6, %p4025_p4 }
  0x32   : > { %4033 = shalt.err (!%p4030_p8)
}
  0x33   : > { %s4034_s22 = scalar_lea.vmem %s4233_s25, 128  ;;  %p4042_p3 = scmp.lt.s32.totalorder %s4233_s25, %s4233_s25 }
  0x34   : > { %p4035_p11 = scmp.ne.s32.totalorder %s4233_s25, %s4034_s22  ;;  %p4043_p5 = scmp.lt.s32.totalorder %s4034_s22, %s4034_s22 }
  0x36   : > { %p4037_p13 = pnand %p4035_p11, %p3995_p12  ;;  %p4044_p7 = por %p4043_p5, %p4042_p3 }
  0x38   : > { %p4038_p0 = pneg %p4037_p13 }
  0x3a   : > { %p4045_p9 = pnand %p4044_p7, %p4038_p0 }
  0x3c   : > { %4048 = shalt.err (!%p4045_p9)
}
  0x3d   : > { %s4155_s29 = smov 16   ;;  %s4156_s30 = smov 1  }
  0x3e   : > { %3938 = dma.hbm_to_vmem [thread:$0]  (!%p4229_p10), %s4759_s2, 128, %s4233_s25, [#allocation6], %s4155_s29, %s4155_s29, %s4156_s30  }
  0x3f   : > { %s4286_s6 = sadd.s32 1, %s4149_s15   ;;  %s27_s10 = sadd.s32 1, %s4145_s14 }
  0x40   : > { %s24_s9 = ssub.s32 %s4149_s15, %s4286_s6  ;;  %p34_p1 = scmp.ne.s32.totalorder %s4145_s14, %s4141_s13 }
  0x41   : > { %p25_p12 = scmp.eq.s32.totalorder %s24_s9, 0  ;;  %p35_p2 = scmp.eq.s32.totalorder %s4149_s15, 0 }
  0x42   : > { %p4768_p6 = scmp.eq.s32.totalorder %s4202_s16, 3  ;;  %p3949_p11 = scmp.lt.s32.totalorder %s4149_s15, 4 }
  0x43   : > { %s4295_s11 = scalar_select %p25_p12, %s4145_s14, %s27_s10  }
  0x44   : > { %p36_p4 = por %p35_p2, %p34_p1  ;;  %p4299_p8 = por %p4768_p6, %p34_p1 }
  0x45   : > { %s158_s23 = sand.u32 1, %s4145_s14   ;;  %s2638_s25 = sshll.u32 %s4149_s15, 12 }
  0x46   : > { %s2617_s21 = sshll.u32 %s158_s23, 8  ;;  %s4309_s27 = scalar_lea.hbm %s4757_s0, %s2638_s25 }
  0x47   : > { %s162_s28 = scalar_lea.vmem [#allocation2], %s2617_s21  ;;  %p4313_p10 = pnand %p3949_p11, %p36_p4 }
  0x48   : > { %s169_s22 = sshll.u32 %s162_s28, 4  ;;  %s4317_s30 = scalar_lea.sflag [#allocation3], %s158_s23  ;;  %s4311_s22 = int_to_ptr.vmem [resolvable:$true] %s169_s22 }
  0x49   : > { %s4049_s4 = scalar_lea.hbm %s4309_s27, 4096  ;;  %p4051_p0 = pneg %p4313_p10 }
  0x4a   : > { %p4050_p13 = scmp.ne.s32.totalorder %s4309_s27, %s4049_s4  ;;  %s4054_s10 = scalar_lea.hbm %s4757_s0, 16384 }
  0x4b   : > { %p4055_p7 = scmp.lt.u32.totalorder %s4309_s27, %s4757_s0  ;;  %p4056_p9 = scmp.lt.u32.totalorder %s4054_s10, %s4049_s4 }
  0x4c   : > { %p4052_p3 = pnand %p4051_p0, %p4050_p13  ;;  %p4058_p1 = scmp.lt.u32.totalorder %s4049_s4, %s4309_s27 }
  0x4d   : > { %p4057_p12 = por %p4056_p9, %p4055_p7 }
  0x4e   : > { %p4053_p5 = pneg %p4052_p3 }
  0x4f   : > { %p4059_p2 = por %p4058_p1, %p4057_p12 }
  0x51   : > { %p4060_p4 = pnand %p4059_p2, %p4053_p5 }
  0x53   : > { %4063 = shalt.err (!%p4060_p4)
}
  0x54   : > { %s4064_s23 = scalar_lea.vmem %s4311_s22, 4096  ;;  %s4157_s24 = smov [#allocation2]  }
  0x55   : > { %p4065_p6 = scmp.ne.s32.totalorder %s4311_s22, %s4064_s23  ;;  %s4069_s26 = sshll.u32 %s4157_s24, 4  ;;  %s4070_s26 = int_to_ptr.vmem [resolvable:$false] %s4069_s26 }
  0x56   : > { %s4071_s28 = scalar_lea.vmem %s4070_s26, 8192  ;;  %p4072_p3 = scmp.lt.s32.totalorder %s4311_s22, %s4070_s26 }
  0x57   : > { %p4067_p11 = pnand %p4065_p6, %p4051_p0  ;;  %p4073_p7 = scmp.lt.s32.totalorder %s4071_s28, %s4064_s23 }
  0x59   : > { %p4068_p13 = pneg %p4067_p11  ;;  %p4074_p9 = por %p4073_p7, %p4072_p3 }
  0x5b   : > { %p4075_p12 = pnand %p4074_p9, %p4068_p13 }
  0x5d   : > { %4078 = shalt.err (!%p4075_p12)
}
  0x5e   : > { %3942 = dma.hbm_to_vmem [thread:$0]  (!%p4313_p10), %s4309_s27, 4096, %s4311_s22, %s4317_s30, %s4153_s7, %s4153_s7, %s4154_s8  }
  0x5f   : > { %p4771_p0 = scmp.ne.s32.totalorder %s4766_s20, 0 }
  0x60   : > { %s4351_s4 = sand.u32 (!%p4771_p0), 1, %s4141_s13   ;;  %p4772_p5 = scmp.ne.s32.totalorder (!%p4771_p0), %s4764_s18, 0 }
  0x61   : > { %181 = sbr.rel (%p4771_p0) target bundleno = 1959 (0x7a7), region = 32  ;;  %s2621_s5 = sshll.u32 (!%p4771_p0), %s4351_s4, 8 }
  0x62   : > { %s184_s9 = scalar_lea.sflag (!%p4771_p0), [#allocation3], %s4351_s4  ;;  %s4357_s29 = scalar_lea.vmem (!%p4771_p0), [#allocation2], %s2621_s5 }
  0x68   : > { %4124 = dma.done.wait (%p4772_p5), %s184_s9, 4096  }
  0x69   : > { %4126 = vsyncadd (%p4772_p5), %s184_s9, 4294963200  ;;  %p4773_p10 = scmp.eq.s32.totalorder %s4202_s16, 0 }
  0x6b   : > { %4128 = dma.done.wait (%p4773_p10), [#allocation6], 16512   ;;  %p4774_p1 = pmov %p4773_p10 }
  0x6c   : > { %v252_v0 = vld [vmem:[#allocation5] sm:$0xff]  ;;  %v253_v1 = vld [vmem:[#allocation5 + $0x8] sm:$0xff]  ;;  %v254_v2 = vld [vmem:[#allocation5 + $0x10] sm:$0xff]  ;;  %s4643_s18 = scalar_lea.vmem [#allocation8], %s2621_s5  ;;  %s2639_s20 = sshll.u32 %s4202_s16, 12 }
  0x6d   : > { %4130 = vsyncadd (%p4774_p1), [#allocation6], 4294950784  ;;  %v3664_v3 = vpack.c.bf16 %v253_v1, %v252_v0  ;;  %v255_v4 = vld [vmem:[#allocation5 + $0x18] sm:$0xff]  ;;  %v256_v6 = vld [vmem:[#allocation5 + $0x20] sm:$0xff]  ;;  %s2520_s7 = sshll.u32 %s4643_s18, 4  ;;  %s4709_s22 = scalar_lea.hbm %s4760_s3, %s2639_s20  ;;  %s4711_s7 = int_to_ptr.vmem [resolvable:$true] %s2520_s7 }
  0x6e   : > { %v3668_v5 = vpack.c.bf16 %v255_v4, %v254_v2  ;;  %v257_v7 = vld [vmem:[#allocation5 + $0x28] sm:$0xff]  ;;  %v220_v9 = vld [vmem:[%s4357_s29] sm:$0xff]  ;;  %v258_v10 = vld [vmem:[#allocation5 + $0x30] sm:$0xff]  ;;  %s2507_s16 = scalar_lea.sflag [#allocation4], %s4351_s4  ;;  %s4079_s30 = scalar_lea.vmem %s4711_s7, 4096 }
  0x6f   : > { %3665 = vmatprep.subr.bf16.mxu0 %v3664_v3  ;;  %v3672_v8 = vpack.c.bf16 %v257_v7, %v256_v6  ;;  %v259_v11 = vld [vmem:[#allocation5 + $0x38] sm:$0xff]  ;;  %3056 = vmatprep.mubr.f32.mxu0 %v220_v9  ;;  %v260_v13 = vld [vmem:[#allocation5 + $0x40] sm:$0xff]  ;;  %v261_v14 = vld [vmem:[#allocation5 + $0x48] sm:$0xff]  ;;  %p4080_p2 = scmp.ne.s32.totalorder %s4711_s7, %s4079_s30  ;;  %s4158_s10 = smov [#allocation8]  }
  0x70   : > { %3667 = vmatpush3.bf16.msra.mxu0 %v3664_v3  ;;  %v3676_v12 = vpack.c.bf16 %v259_v11, %v258_v10  ;;  %v3680_v15 = vpack.c.bf16 %v261_v14, %v260_v13  ;;  %v262_v16 = vld [vmem:[#allocation5 + $0x50] sm:$0xff]  ;;  %v263_v17 = vld [vmem:[#allocation5 + $0x58] sm:$0xff]  ;;  %v533_v18 = vld [vmem:[#allocation5 + $0x80] sm:$0xff]  ;;  %s4083_s21 = sshll.u32 %s4158_s10, 4  ;;  %s4084_s21 = int_to_ptr.vmem [resolvable:$false] %s4083_s21 }
  0x71   : > { %3669 = vmatprep.subr.bf16.mxu0 %v3668_v5  ;;  %v534_v19 = vld [vmem:[#allocation5 + $0x88] sm:$0xff]  ;;  %v535_v20 = vld [vmem:[#allocation5 + $0x90] sm:$0xff]  ;;  %v3684_v21 = vpack.c.bf16 %v263_v17, %v262_v16  ;;  %v264_v22 = vld [vmem:[#allocation5 + $0x60] sm:$0xff]  ;;  %p4081_p4 = pnand %p4080_p2, %p4299_p8  ;;  %s4085_s25 = scalar_lea.vmem %s4084_s21, 8192 }
  0x72   : > { %v3696_v23 = vpack.c.bf16 %v534_v19, %v533_v18  ;;  %v536_v24 = vld [vmem:[#allocation5 + $0x98] sm:$0xff]  ;;  %v265_v25 = vld [vmem:[#allocation5 + $0x68] sm:$0xff]  ;;  %v537_v27 = vld [vmem:[#allocation5 + $0xa0] sm:$0xff]  ;;  %p4086_p11 = scmp.lt.s32.totalorder %s4711_s7, %s4084_s21  ;;  %p4087_p13 = scmp.lt.s32.totalorder %s4085_s25, %s4079_s30 }
  0x73   : > { %v3700_v26 = vpack.c.bf16 %v536_v24, %v535_v20  ;;  %v538_v28 = vld [vmem:[#allocation5 + $0xa8] sm:$0xff]  ;;  %v3688_v29 = vpack.c.bf16 %v265_v25, %v264_v22  ;;  %v266_v30 = vld [vmem:[#allocation5 + $0x70] sm:$0xff]  ;;  %v267_v32 = vld [vmem:[#allocation5 + $0x78] sm:$0xff]  ;;  %p4082_p6 = pneg %p4081_p4 }
  0x74   : > { %3671 = vmatpush3.bf16.msra.mxu0 %v3668_v5  ;;  %3697 = vmatprep.subr.bf16.mxu1 %v3696_v23  ;;  %v3704_v31 = vpack.c.bf16 %v538_v28, %v537_v27  ;;  %v539_v33 = vld [vmem:[#allocation5 + $0xb0] sm:$0xff]  ;;  %v540_v34 = vld [vmem:[#allocation5 + $0xb8] sm:$0xff]  ;;  %v3692_v35 = vpack.c.bf16 %v267_v32, %v266_v30  ;;  %v541_v37 = vld [vmem:[#allocation5 + $0xc0] sm:$0xff]  ;;  %p4088_p3 = por %p4087_p13, %p4086_p11 }
  0x75   : > { %3673 = vmatprep.subr.bf16.mxu0 %v3672_v8  ;;  %3699 = vmatpush3.bf16.msra.mxu1 %v3696_v23  ;;  %v3708_v36 = vpack.c.bf16 %v540_v34, %v539_v33  ;;  %v542_v38 = vld [vmem:[#allocation5 + $0xc8] sm:$0xff]  ;;  %v543_v40 = vld [vmem:[#allocation5 + $0xd0] sm:$0xff]  ;;  %v544_v41 = vld [vmem:[#allocation5 + $0xd8] sm:$0xff] }
  0x76   : > { %3701 = vmatprep.subr.bf16.mxu1 %v3700_v26  ;;  %v3712_v39 = vpack.c.bf16 %v542_v38, %v541_v37  ;;  %v221_v42 = vld [vmem:[%s4357_s29 + $0x8] sm:$0xff]  ;;  %v222_v43 = vld [vmem:[%s4357_s29 + $0x10] sm:$0xff]  ;;  %v3716_v44 = vpack.c.bf16 %v544_v41, %v543_v40  ;;  %v545_v45 = vld [vmem:[#allocation5 + $0xe0] sm:$0xff]  ;;  %p4089_p7 = pnand %p4088_p3, %p4082_p6 }
  0x77   : > { %v546_v46 = vld [vmem:[#allocation5 + $0xe8] sm:$0xff]  ;;  %v223_v47 = vld [vmem:[%s4357_s29 + $0x18] sm:$0xff]  ;;  %v224_v48 = vld [vmem:[%s4357_s29 + $0x20] sm:$0xff] }
  0x78   : > { %3675 = vmatpush3.bf16.msra.mxu0 %v3672_v8  ;;  %v3720_v49 = vpack.c.bf16 %v546_v46, %v545_v45  ;;  %v225_v50 = vld [vmem:[%s4357_s29 + $0x28] sm:$0xff]  ;;  %v226_v51 = vld [vmem:[%s4357_s29 + $0x30] sm:$0xff]  ;;  %v227_v52 = vld [vmem:[%s4357_s29 + $0x38] sm:$0xff] }
  0x79   : > { %3677 = vmatprep.subr.bf16.mxu0 %v3676_v12  ;;  %3703 = vmatpush3.bf16.msra.mxu1 %v3700_v26  ;;  %v228_v53 = vld [vmem:[%s4357_s29 + $0x40] sm:$0xff]  ;;  %v229_v54 = vld [vmem:[%s4357_s29 + $0x48] sm:$0xff]  ;;  %v230_v55 = vld [vmem:[%s4357_s29 + $0x50] sm:$0xff] }
  0x7a   : > { %3705 = vmatprep.subr.bf16.mxu1 %v3704_v31  ;;  %v231_v56 = vld [vmem:[%s4357_s29 + $0x58] sm:$0xff]  ;;  %v232_v57 = vld [vmem:[%s4357_s29 + $0x60] sm:$0xff]  ;;  %v233_v58 = vld [vmem:[%s4357_s29 + $0x68] sm:$0xff] }
  0x7b   : > { %v234_v59 = vld [vmem:[%s4357_s29 + $0x70] sm:$0xff]  ;;  %v235_v60 = vld [vmem:[%s4357_s29 + $0x78] sm:$0xff]  ;;  %v236_v61 = vld [vmem:[%s4357_s29 + $0x80] sm:$0xff] }
  0x7c   : > { %3679 = vmatpush3.bf16.msra.mxu0 %v3676_v12  ;;  %v237_v62 = vld [vmem:[%s4357_s29 + $0x88] sm:$0xff]  ;;  %v238_v63 = vld [vmem:[%s4357_s29 + $0x90] sm:$0xff]  ;;  %v239_v0 = vld [vmem:[%s4357_s29 + $0x98] sm:$0xff] }
  0x7d   : > { %3681 = vmatprep.subr.bf16.mxu0 %v3680_v15  ;;  %3707 = vmatpush3.bf16.msra.mxu1 %v3704_v31  ;;  %v240_v1 = vld [vmem:[%s4357_s29 + $0xa0] sm:$0xff]  ;;  %v241_v2 = vld [vmem:[%s4357_s29 + $0xa8] sm:$0xff]  ;;  %v242_v3 = vld [vmem:[%s4357_s29 + $0xb0] sm:$0xff] }
  0x7e   : > { %3709 = vmatprep.subr.bf16.mxu1 %v3708_v36  ;;  %v243_v4 = vld [vmem:[%s4357_s29 + $0xb8] sm:$0xff]  ;;  %v244_v5 = vld [vmem:[%s4357_s29 + $0xc0] sm:$0xff]  ;;  %v245_v6 = vld [vmem:[%s4357_s29 + $0xc8] sm:$0xff] }
  0x7f   : > { %v246_v7 = vld [vmem:[%s4357_s29 + $0xd0] sm:$0xff]  ;;  %v247_v8 = vld [vmem:[%s4357_s29 + $0xd8] sm:$0xff]  ;;  %v248_v9 = vld [vmem:[%s4357_s29 + $0xe0] sm:$0xff] }
  0x80   : > { %3683 = vmatpush3.bf16.msra.mxu0 %v3680_v15  ;;  %v249_v10 = vld [vmem:[%s4357_s29 + $0xe8] sm:$0xff]  ;;  %v250_v11 = vld [vmem:[%s4357_s29 + $0xf0] sm:$0xff]  ;;  %v251_v12 = vld [vmem:[%s4357_s29 + $0xf8] sm:$0xff] }
  0x81   : > { %3685 = vmatprep.subr.bf16.mxu0 %v3684_v21  ;;  %3711 = vmatpush3.bf16.msra.mxu1 %v3708_v36  ;;  %v547_v13 = vld [vmem:[#allocation5 + $0xf0] sm:$0xff]  ;;  %v548_v14 = vld [vmem:[#allocation5 + $0xf8] sm:$0xff]  ;;  %v815_v16 = vld [vmem:[#allocation5 + $0x100] sm:$0xff] }
  0x82   : > { %3713 = vmatprep.subr.bf16.mxu1 %v3712_v39  ;;  %v3724_v15 = vpack.c.bf16 %v548_v14, %v547_v13  ;;  %v816_v17 = vld [vmem:[#allocation5 + $0x108] sm:$0xff]  ;;  %v817_v18 = vld [vmem:[#allocation5 + $0x110] sm:$0xff]  ;;  %v818_v20 = vld [vmem:[#allocation5 + $0x118] sm:$0xff] }
  0x83   : > { %v3728_v19 = vpack.c.bf16 %v816_v17, %v815_v16  ;;  %v819_v22 = vld [vmem:[#allocation5 + $0x120] sm:$0xff]  ;;  %v820_v23 = vld [vmem:[#allocation5 + $0x128] sm:$0xff]  ;;  %v821_v25 = vld [vmem:[#allocation5 + $0x130] sm:$0xff] }
  0x84   : > { %3687 = vmatpush3.bf16.msra.mxu0 %v3684_v21  ;;  %v3732_v21 = vpack.c.bf16 %v818_v20, %v817_v18  ;;  %v3736_v24 = vpack.c.bf16 %v820_v23, %v819_v22  ;;  %v822_v26 = vld [vmem:[#allocation5 + $0x138] sm:$0xff]  ;;  %v823_v28 = vld [vmem:[#allocation5 + $0x140] sm:$0xff]  ;;  %v825_v31 = vld [vmem:[#allocation5 + $0x150] sm:$0xff] }
  0x85   : > { %3689 = vmatprep.subr.bf16.mxu0 %v3688_v29  ;;  %3715 = vmatpush3.bf16.msra.mxu1 %v3712_v39  ;;  %v3740_v27 = vpack.c.bf16 %v822_v26, %v821_v25  ;;  %v826_v32 = vld [vmem:[#allocation5 + $0x158] sm:$0xff]  ;;  %v827_v34 = vld [vmem:[#allocation5 + $0x160] sm:$0xff]  ;;  %v829_v37 = vld [vmem:[#allocation5 + $0x170] sm:$0xff] }
  0x86   : > { %3717 = vmatprep.subr.bf16.mxu1 %v3716_v44  ;;  %v3748_v33 = vpack.c.bf16 %v826_v32, %v825_v31  ;;  %v830_v38 = vld [vmem:[#allocation5 + $0x178] sm:$0xff]  ;;  %v4399_v40 = vld [vmem:[#allocation7] ss:$0 sm:$0xff] }
  0x87   : > { %v3756_v39 = vpack.c.bf16 %v830_v38, %v829_v37 }
  0x88   : > { %3691 = vmatpush3.bf16.msra.mxu0 %v3688_v29  ;;  %v824_v29 = vld [vmem:[#allocation5 + $0x148] sm:$0xff] }
  0x89   : > { %3693 = vmatprep.subr.bf16.mxu0 %v3692_v35  ;;  %3719 = vmatpush3.bf16.msra.mxu1 %v3716_v44  ;;  %v3744_v30 = vpack.c.bf16 %v824_v29, %v823_v28 }
  0x8a   : > { %3721 = vmatprep.subr.bf16.mxu1 %v3720_v49 }
  0x8c   : > { %3695 = vmatpush3.bf16.msra.mxu0 %v3692_v35  ;;  %v828_v35 = vld [vmem:[#allocation5 + $0x168] sm:$0xff] }
  0x8d   : > { %3723 = vmatpush3.bf16.msra.mxu1 %v3720_v49  ;;  %3729 = vmatprep.subr.bf16.mxu0 %v3728_v19  ;;  %v3752_v36 = vpack.c.bf16 %v828_v35, %v827_v34 }
  0x8e   : > { %3725 = vmatprep.subr.bf16.mxu1 %v3724_v15 }
  0x8f   : > { %3057 = vmatmul.mubr.f32.vlgmr.msra.gmra.mrb[0].mxu0 %v221_v42 }
  0x90   : > { %3059 = vmatprep.mubr.f32.mxu0 %v222_v43  ;;  %3731 = vmatpush3.bf16.msra.mxu0 %v3728_v19 }
  0x91   : > { %3727 = vmatpush3.bf16.msra.mxu1 %v3724_v15  ;;  %3733 = vmatprep.subr.bf16.mxu0 %v3732_v21 }
  0x93   : > { %3060 = vmatmul.mubr.f32.gmra.mrb[2].mxu0 %v223_v47 }
  0x94   : > { %3062 = vmatprep.mubr.f32.mxu0 %v224_v48  ;;  %3735 = vmatpush3.bf16.msra.mxu0 %v3732_v21 }
  0x95   : > { %3737 = vmatprep.subr.bf16.mxu0 %v3736_v24 }
  0x97   : > { %3063 = vmatmul.mubr.f32.gmra.mrb[4].mxu0 %v225_v50 }
  0x98   : > { %3065 = vmatprep.mubr.f32.mxu0 %v226_v51  ;;  %3739 = vmatpush3.bf16.msra.mxu0 %v3736_v24 }
  0x99   : > { %3741 = vmatprep.subr.bf16.mxu0 %v3740_v27 }
  0x9b   : > { %3066 = vmatmul.mubr.f32.gmra.mrb[6].mxu0 %v227_v52 }
  0x9c   : > { %3068 = vmatprep.mubr.f32.mxu0 %v228_v53  ;;  %3743 = vmatpush3.bf16.msra.mxu0 %v3740_v27 }
  0x9d   : > { %3745 = vmatprep.subr.bf16.mxu0 %v3744_v30 }
  0x9f   : > { %3069 = vmatmul.mubr.f32.gmra.mrb[8].mxu0 %v229_v54 }
  0xa0   : > { %3071 = vmatprep.mubr.f32.mxu0 %v230_v55  ;;  %3747 = vmatpush3.bf16.msra.mxu0 %v3744_v30 }
  0xa1   : > { %3749 = vmatprep.subr.bf16.mxu0 %v3748_v33 }
  0xa3   : > { %3072 = vmatmul.mubr.f32.gmra.mrb[10].mxu0 %v231_v56 }
  0xa4   : > { %3074 = vmatprep.mubr.f32.mxu0 %v232_v57  ;;  %3751 = vmatpush3.bf16.msra.mxu0 %v3748_v33 }
  0xa5   : > { %3753 = vmatprep.subr.bf16.mxu0 %v3752_v36 }
  0xa7   : > { %3075 = vmatmul.mubr.f32.gmra.mrb[12].mxu0 %v233_v58 }
  0xa8   : > { %3077 = vmatprep.mubr.f32.mxu0 %v234_v59  ;;  %3755 = vmatpush3.bf16.msra.mxu0 %v3752_v36 }
  0xa9   : > { %3757 = vmatprep.subr.bf16.mxu0 %v3756_v39 }
  0xab   : > { %3078 = vmatmul.mubr.f32.gmra.mrb[14].mxu0 %v235_v60 }
  0xac   : > { %3080 = vmatprep.mubr.f32.mxu0 %v236_v61  ;;  %3759 = vmatpush3.bf16.msra.mxu0 %v3756_v39 }
  0xaf   : > { %3081 = vmatmul.mubr.f32.gmra.mrb[16].mxu0 %v237_v62 }
  0xb0   : > { %3083 = vmatprep.mubr.f32.mxu0 %v238_v63 }
  0xb3   : > { %3084 = vmatmul.mubr.f32.gmra.mrb[18].mxu0 %v239_v0 }
  0xb4   : > { %3086 = vmatprep.mubr.f32.mxu0 %v240_v1 }
  0xb7   : > { %3087 = vmatmul.mubr.f32.gmra.mrb[20].mxu0 %v241_v2 }
  0xb8   : > { %3089 = vmatprep.mubr.f32.mxu0 %v242_v3 }
  0xbb   : > { %3090 = vmatmul.mubr.f32.gmra.mrb[22].mxu0 %v243_v4 }
  0xbc   : > { %3092 = vmatprep.mubr.f32.mxu0 %v244_v5 }
  0xbf   : > { %3093 = vmatmul.mubr.f32.gmra.mrb[24].mxu0 %v245_v6 }
  0xc0   : > { %3095 = vmatprep.mubr.f32.mxu0 %v246_v7 }
  0xc3   : > { %3096 = vmatmul.mubr.f32.gmra.mrb[26].mxu0 %v247_v8 }
  0xc4   : > { %3098 = vmatprep.mubr.f32.mxu0 %v248_v9 }
  0xc7   : > { %3099 = vmatmul.mubr.f32.gmra.mrb[28].mxu0 %v249_v10 }
  0xc8   : > { %3101 = vmatprep.mubr.f32.mxu0 %v250_v11 }
  0xcb   : > { %3102 = vmatmul.mubr.f32.gmra.mrb[30].mxu0 %v251_v12 }
 0x162   : > { %v3058_v41 = vpop.f32.mrb[0].mxu0 }
 0x163   : > { %v347_v42 = vadd.f32 %v3058_v41, %v4399_v40  ;;  %v341_v43 = vpop.f32.mrb[1].mxu0 }
 0x164   : > { %v342_v44 = vadd.f32 %v4399_v40, %v341_v43 }
 0x165   : > { %v501_v47 = vmax.f32 %v347_v42, 0.0 }
 0x166   : > { %v3061_v45 = vpop.f32.mrb[2].mxu0  ;;  %v500_v46 = vmax.f32 %v342_v44, 0.0 }
 0x167   : > { %v357_v48 = vadd.f32 %v3061_v45, %v4399_v40  ;;  %v351_v49 = vpop.f32.mrb[3].mxu0 }
 0x168   : > { %v352_v50 = vadd.f32 %v4399_v40, %v351_v49  ;;  %3136 = vmatprep.mubr.f32.mxu1 %v500_v46 }
 0x169   : > { %3137 = vmatmul.mubr.f32.vlgmr.msra.gmra.mrb[0].mxu1 %v501_v47  ;;  %v503_v53 = vmax.f32 %v357_v48, 0.0 }
 0x16a   : > { %v502_v51 = vmax.f32 %v352_v50, 0.0  ;;  %v3064_v52 = vpop.f32.mrb[4].mxu0 }
 0x16b   : > { %v367_v54 = vadd.f32 %v3064_v52, %v4399_v40  ;;  %v361_v55 = vpop.f32.mrb[5].mxu0 }
 0x16c   : > { %v362_v56 = vadd.f32 %v4399_v40, %v361_v55  ;;  %3139 = vmatprep.mubr.f32.mxu1 %v502_v51 }
 0x16d   : > { %3140 = vmatmul.mubr.f32.gmra.mrb[2].mxu1 %v503_v53  ;;  %v505_v59 = vmax.f32 %v367_v54, 0.0 }
 0x16e   : > { %v504_v57 = vmax.f32 %v362_v56, 0.0  ;;  %v3067_v58 = vpop.f32.mrb[6].mxu0 }
 0x16f   : > { %v377_v60 = vadd.f32 %v3067_v58, %v4399_v40  ;;  %v371_v61 = vpop.f32.mrb[7].mxu0 }
 0x170   : > { %v372_v62 = vadd.f32 %v4399_v40, %v371_v61  ;;  %3142 = vmatprep.mubr.f32.mxu1 %v504_v57 }
 0x171   : > { %3143 = vmatmul.mubr.f32.gmra.mrb[4].mxu1 %v505_v59  ;;  %v507_v1 = vmax.f32 %v377_v60, 0.0 }
 0x172   : > { %v506_v63 = vmax.f32 %v372_v62, 0.0  ;;  %v3070_v0 = vpop.f32.mrb[8].mxu0 }
 0x173   : > { %v387_v2 = vadd.f32 %v3070_v0, %v4399_v40  ;;  %v381_v3 = vpop.f32.mrb[9].mxu0 }
 0x174   : > { %v382_v4 = vadd.f32 %v4399_v40, %v381_v3  ;;  %3145 = vmatprep.mubr.f32.mxu1 %v506_v63 }
 0x175   : > { %3146 = vmatmul.mubr.f32.gmra.mrb[6].mxu1 %v507_v1  ;;  %v509_v7 = vmax.f32 %v387_v2, 0.0 }
 0x176   : > { %v508_v5 = vmax.f32 %v382_v4, 0.0  ;;  %v3073_v6 = vpop.f32.mrb[10].mxu0 }
 0x177   : > { %v397_v8 = vadd.f32 %v3073_v6, %v4399_v40  ;;  %v391_v9 = vpop.f32.mrb[11].mxu0 }
 0x178   : > { %v392_v10 = vadd.f32 %v4399_v40, %v391_v9  ;;  %3148 = vmatprep.mubr.f32.mxu1 %v508_v5 }
 0x179   : > { %3149 = vmatmul.mubr.f32.gmra.mrb[8].mxu1 %v509_v7  ;;  %v511_v13 = vmax.f32 %v397_v8, 0.0 }
 0x17a   : > { %v510_v11 = vmax.f32 %v392_v10, 0.0  ;;  %v3076_v12 = vpop.f32.mrb[12].mxu0  ;;  %v1097_v10 = vld [vmem:[#allocation5 + $0x180] sm:$0xff] }
 0x17b   : > { %v407_v14 = vadd.f32 %v3076_v12, %v4399_v40  ;;  %v401_v15 = vpop.f32.mrb[13].mxu0  ;;  %v1099_v12 = vld [vmem:[#allocation5 + $0x190] sm:$0xff] }
 0x17c   : > { %v402_v16 = vadd.f32 %v4399_v40, %v401_v15  ;;  %3151 = vmatprep.mubr.f32.mxu1 %v510_v11  ;;  %v1098_v11 = vld [vmem:[#allocation5 + $0x188] sm:$0xff] }
 0x17d   : > { %3152 = vmatmul.mubr.f32.gmra.mrb[10].mxu1 %v511_v13  ;;  %v513_v19 = vmax.f32 %v407_v14, 0.0  ;;  %v3760_v13 = vpack.c.bf16 %v1098_v11, %v1097_v10  ;;  %v1100_v14 = vld [vmem:[#allocation5 + $0x198] sm:$0xff] }
 0x17e   : > { %v512_v17 = vmax.f32 %v402_v16, 0.0  ;;  %v3079_v18 = vpop.f32.mrb[14].mxu0  ;;  %v3764_v15 = vpack.c.bf16 %v1100_v14, %v1099_v12  ;;  %v1101_v16 = vld [vmem:[#allocation5 + $0x1a0] sm:$0xff] }
 0x17f   : > { %v417_v20 = vadd.f32 %v3079_v18, %v4399_v40  ;;  %v411_v21 = vpop.f32.mrb[15].mxu0  ;;  %3761 = vmatprep.subr.bf16.mxu1 %v3760_v13 }
 0x180   : > { %v412_v22 = vadd.f32 %v4399_v40, %v411_v21  ;;  %3154 = vmatprep.mubr.f32.mxu1 %v512_v17  ;;  %v1102_v17 = vld [vmem:[#allocation5 + $0x1a8] sm:$0xff]  ;;  %3763 = vmatpush3.bf16.msra.mxu1 %v3760_v13  ;;  %v1105_v21 = vld [vmem:[#allocation5 + $0x1c0] sm:$0xff] }
 0x181   : > { %3155 = vmatmul.mubr.f32.gmra.mrb[12].mxu1 %v513_v19  ;;  %v515_v25 = vmax.f32 %v417_v20, 0.0  ;;  %3765 = vmatprep.subr.bf16.mxu1 %v3764_v15  ;;  %v3768_v18 = vpack.c.bf16 %v1102_v17, %v1101_v16  ;;  %v1103_v19 = vld [vmem:[#allocation5 + $0x1b0] sm:$0xff] }
 0x182   : > { %v514_v23 = vmax.f32 %v412_v22, 0.0  ;;  %v3082_v24 = vpop.f32.mrb[16].mxu0  ;;  %v1106_v22 = vld [vmem:[#allocation5 + $0x1c8] sm:$0xff] }
 0x183   : > { %v427_v26 = vadd.f32 %v3082_v24, %v4399_v40  ;;  %v421_v27 = vpop.f32.mrb[17].mxu0  ;;  %v1107_v24 = vld [vmem:[#allocation5 + $0x1d0] sm:$0xff] }
 0x184   : > { %v422_v28 = vadd.f32 %v4399_v40, %v421_v27  ;;  %3157 = vmatprep.mubr.f32.mxu1 %v514_v23  ;;  %3767 = vmatpush3.bf16.msra.mxu1 %v3764_v15  ;;  %v3776_v23 = vpack.c.bf16 %v1106_v22, %v1105_v21  ;;  %v1109_v27 = vld [vmem:[#allocation5 + $0x1e0] sm:$0xff] }
 0x185   : > { %3158 = vmatmul.mubr.f32.gmra.mrb[14].mxu1 %v515_v25  ;;  %v517_v31 = vmax.f32 %v427_v26, 0.0  ;;  %3769 = vmatprep.subr.bf16.mxu1 %v3768_v18  ;;  %v1108_v25 = vld [vmem:[#allocation5 + $0x1d8] sm:$0xff] }
 0x186   : > { %v516_v29 = vmax.f32 %v422_v28, 0.0  ;;  %v3085_v30 = vpop.f32.mrb[18].mxu0  ;;  %v3780_v26 = vpack.c.bf16 %v1108_v25, %v1107_v24  ;;  %v1110_v28 = vld [vmem:[#allocation5 + $0x1e8] sm:$0xff] }
 0x187   : > { %v437_v32 = vadd.f32 %v3085_v30, %v4399_v40  ;;  %v431_v33 = vpop.f32.mrb[19].mxu0  ;;  %v1111_v30 = vld [vmem:[#allocation5 + $0x1f0] sm:$0xff] }
 0x188   : > { %v432_v34 = vadd.f32 %v4399_v40, %v431_v33  ;;  %3160 = vmatprep.mubr.f32.mxu1 %v516_v29  ;;  %3771 = vmatpush3.bf16.msra.mxu1 %v3768_v18  ;;  %v3784_v29 = vpack.c.bf16 %v1110_v28, %v1109_v27  ;;  %v4433_v33 = vld [vmem:[#allocation7 + $0x1] ss:$0 sm:$0xff] }
 0x189   : > { %3161 = vmatmul.mubr.f32.gmra.mrb[16].mxu1 %v517_v31  ;;  %v519_v37 = vmax.f32 %v437_v32, 0.0  ;;  %v1112_v31 = vld [vmem:[#allocation5 + $0x1f8] sm:$0xff] }
 0x18a   : > { %v518_v35 = vmax.f32 %v432_v34, 0.0  ;;  %v3088_v36 = vpop.f32.mrb[20].mxu0  ;;  %v3788_v32 = vpack.c.bf16 %v1112_v31, %v1111_v30 }
 0x18b   : > { %v447_v38 = vadd.f32 %v3088_v36, %v4399_v40  ;;  %v441_v39 = vpop.f32.mrb[21].mxu0 }
 0x18c   : > { %v442_v41 = vadd.f32 %v4399_v40, %v441_v39  ;;  %3163 = vmatprep.mubr.f32.mxu1 %v518_v35 }
 0x18d   : > { %3164 = vmatmul.mubr.f32.gmra.mrb[18].mxu1 %v519_v37  ;;  %v521_v44 = vmax.f32 %v447_v38, 0.0 }
 0x18e   : > { %v520_v42 = vmax.f32 %v442_v41, 0.0  ;;  %v3091_v43 = vpop.f32.mrb[22].mxu0 }
 0x18f   : > { %v457_v45 = vadd.f32 %v3091_v43, %v4399_v40  ;;  %v451_v46 = vpop.f32.mrb[23].mxu0 }
 0x190   : > { %v452_v47 = vadd.f32 %v4399_v40, %v451_v46  ;;  %3166 = vmatprep.mubr.f32.mxu1 %v520_v42 }
 0x191   : > { %3167 = vmatmul.mubr.f32.gmra.mrb[20].mxu1 %v521_v44  ;;  %v523_v50 = vmax.f32 %v457_v45, 0.0 }
 0x192   : > { %v522_v48 = vmax.f32 %v452_v47, 0.0  ;;  %v3094_v49 = vpop.f32.mrb[24].mxu0 }
 0x193   : > { %v467_v51 = vadd.f32 %v3094_v49, %v4399_v40  ;;  %v461_v52 = vpop.f32.mrb[25].mxu0 }
 0x194   : > { %v462_v53 = vadd.f32 %v4399_v40, %v461_v52  ;;  %3169 = vmatprep.mubr.f32.mxu1 %v522_v48 }
 0x195   : > { %3170 = vmatmul.mubr.f32.gmra.mrb[22].mxu1 %v523_v50  ;;  %v525_v56 = vmax.f32 %v467_v51, 0.0 }
 0x196   : > { %v524_v54 = vmax.f32 %v462_v53, 0.0  ;;  %v3097_v55 = vpop.f32.mrb[26].mxu0 }
 0x197   : > { %v477_v57 = vadd.f32 %v3097_v55, %v4399_v40  ;;  %v471_v58 = vpop.f32.mrb[27].mxu0 }
 0x198   : > { %v472_v59 = vadd.f32 %v4399_v40, %v471_v58  ;;  %3172 = vmatprep.mubr.f32.mxu1 %v524_v54 }
 0x199   : > { %3173 = vmatmul.mubr.f32.gmra.mrb[24].mxu1 %v525_v56  ;;  %v527_v62 = vmax.f32 %v477_v57, 0.0 }
 0x19a   : > { %v526_v60 = vmax.f32 %v472_v59, 0.0  ;;  %v3100_v61 = vpop.f32.mrb[28].mxu0 }
 0x19b   : > { %v487_v63 = vadd.f32 %v3100_v61, %v4399_v40  ;;  %v481_v0 = vpop.f32.mrb[29].mxu0 }
 0x19c   : > { %v482_v1 = vadd.f32 %v4399_v40, %v481_v0  ;;  %3175 = vmatprep.mubr.f32.mxu1 %v526_v60 }
 0x19d   : > { %3176 = vmatmul.mubr.f32.gmra.mrb[26].mxu1 %v527_v62  ;;  %v529_v4 = vmax.f32 %v487_v63, 0.0 }
 0x19e   : > { %v528_v2 = vmax.f32 %v482_v1, 0.0  ;;  %v3103_v3 = vpop.f32.mrb[30].mxu0 }
 0x19f   : > { %v497_v5 = vadd.f32 %v3103_v3, %v4399_v40  ;;  %v491_v6 = vpop.f32.mrb[31].mxu0 }
 0x1a0   : > { %v492_v7 = vadd.f32 %v4399_v40, %v491_v6  ;;  %3178 = vmatprep.mubr.f32.mxu1 %v528_v2  ;;  %v1104_v40 = vld [vmem:[#allocation5 + $0x1b8] sm:$0xff] }
 0x1a1   : > { %3179 = vmatmul.mubr.f32.gmra.mrb[28].mxu1 %v529_v4  ;;  %v531_v9 = vmax.f32 %v497_v5, 0.0  ;;  %v3772_v20 = vpack.c.bf16 %v1104_v40, %v1103_v19 }
 0x1a2   : > { %v530_v8 = vmax.f32 %v492_v7, 0.0 }
 0x1a3   : > { %3773 = vmatprep.subr.bf16.mxu1 %v3772_v20 }
 0x1a4   : > { %3181 = vmatprep.mubr.f32.mxu1 %v530_v8  ;;  %3775 = vmatpush3.bf16.msra.mxu1 %v3772_v20 }
 0x1a5   : > { %3182 = vmatmul.mubr.f32.gmra.mrb[30].mxu1 %v531_v9  ;;  %3777 = vmatprep.subr.bf16.mxu1 %v3776_v23 }
 0x1a8   : > { %3779 = vmatpush3.bf16.msra.mxu1 %v3776_v23 }
 0x1a9   : > { %3781 = vmatprep.subr.bf16.mxu1 %v3780_v26 }
 0x1ac   : > { %3783 = vmatpush3.bf16.msra.mxu1 %v3780_v26 }
 0x1ad   : > { %3785 = vmatprep.subr.bf16.mxu1 %v3784_v29 }
 0x1b0   : > { %3787 = vmatpush3.bf16.msra.mxu1 %v3784_v29 }
 0x1b1   : > { %3789 = vmatprep.subr.bf16.mxu1 %v3788_v32 }
 0x1b4   : > { %3791 = vmatpush3.bf16.msra.mxu1 %v3788_v32 }
 0x23c   : > { %v3138_v34 = vpop.f32.mrb[0].mxu1 }
 0x23d   : > { %v629_v35 = vadd.f32 %v3138_v34, %v4433_v33  ;;  %v623_v36 = vpop.f32.mrb[1].mxu1 }
 0x23e   : > { %v624_v37 = vadd.f32 %v4433_v33, %v623_v36 }
 0x23f   : > { %v783_v41 = vmax.f32 %v629_v35, 0.0 }
 0x240   : > { %v782_v38 = vmax.f32 %v624_v37, 0.0  ;;  %v3141_v39 = vpop.f32.mrb[2].mxu1 }
 0x241   : > { %v639_v42 = vadd.f32 %v3141_v39, %v4433_v33  ;;  %v633_v43 = vpop.f32.mrb[3].mxu1 }
 0x242   : > { %v634_v44 = vadd.f32 %v4433_v33, %v633_v43  ;;  %3216 = vmatprep.mubr.f32.mxu0 %v782_v38 }
 0x243   : > { %3217 = vmatmul.mubr.f32.vlgmr.msra.gmra.mrb[32].mxu0 %v783_v41  ;;  %v785_v47 = vmax.f32 %v639_v42, 0.0 }
 0x244   : > { %v784_v45 = vmax.f32 %v634_v44, 0.0  ;;  %v3144_v46 = vpop.f32.mrb[4].mxu1 }
 0x245   : > { %v649_v48 = vadd.f32 %v3144_v46, %v4433_v33  ;;  %v643_v49 = vpop.f32.mrb[5].mxu1 }
 0x246   : > { %v644_v50 = vadd.f32 %v4433_v33, %v643_v49  ;;  %3219 = vmatprep.mubr.f32.mxu0 %v784_v45 }
 0x247   : > { %3220 = vmatmul.mubr.f32.gmra.mrb[34].mxu0 %v785_v47  ;;  %v787_v53 = vmax.f32 %v649_v48, 0.0 }
 0x248   : > { %v786_v51 = vmax.f32 %v644_v50, 0.0  ;;  %v3147_v52 = vpop.f32.mrb[6].mxu1 }
 0x249   : > { %v659_v54 = vadd.f32 %v3147_v52, %v4433_v33  ;;  %v653_v55 = vpop.f32.mrb[7].mxu1 }
 0x24a   : > { %v654_v56 = vadd.f32 %v4433_v33, %v653_v55  ;;  %3222 = vmatprep.mubr.f32.mxu0 %v786_v51 }
 0x24b   : > { %3223 = vmatmul.mubr.f32.gmra.mrb[36].mxu0 %v787_v53  ;;  %v789_v59 = vmax.f32 %v659_v54, 0.0 }
 0x24c   : > { %v788_v57 = vmax.f32 %v654_v56, 0.0  ;;  %v3150_v58 = vpop.f32.mrb[8].mxu1 }
 0x24d   : > { %v669_v60 = vadd.f32 %v3150_v58, %v4433_v33  ;;  %v663_v61 = vpop.f32.mrb[9].mxu1 }
 0x24e   : > { %v664_v62 = vadd.f32 %v4433_v33, %v663_v61  ;;  %3225 = vmatprep.mubr.f32.mxu0 %v788_v57 }
 0x24f   : > { %3226 = vmatmul.mubr.f32.gmra.mrb[38].mxu0 %v789_v59  ;;  %v791_v1 = vmax.f32 %v669_v60, 0.0 }
 0x250   : > { %v790_v63 = vmax.f32 %v664_v62, 0.0  ;;  %v3153_v0 = vpop.f32.mrb[10].mxu1 }
 0x251   : > { %v679_v2 = vadd.f32 %v3153_v0, %v4433_v33  ;;  %v673_v3 = vpop.f32.mrb[11].mxu1 }
 0x252   : > { %v674_v4 = vadd.f32 %v4433_v33, %v673_v3  ;;  %3228 = vmatprep.mubr.f32.mxu0 %v790_v63 }
 0x253   : > { %3229 = vmatmul.mubr.f32.gmra.mrb[40].mxu0 %v791_v1  ;;  %v793_v7 = vmax.f32 %v679_v2, 0.0 }
 0x254   : > { %v792_v5 = vmax.f32 %v674_v4, 0.0  ;;  %v3156_v6 = vpop.f32.mrb[12].mxu1  ;;  %v1379_v4 = vld [vmem:[#allocation5 + $0x200] sm:$0xff] }
 0x255   : > { %v689_v8 = vadd.f32 %v3156_v6, %v4433_v33  ;;  %v683_v9 = vpop.f32.mrb[13].mxu1  ;;  %v1381_v6 = vld [vmem:[#allocation5 + $0x210] sm:$0xff] }
 0x256   : > { %v684_v10 = vadd.f32 %v4433_v33, %v683_v9  ;;  %3231 = vmatprep.mubr.f32.mxu0 %v792_v5  ;;  %v1380_v5 = vld [vmem:[#allocation5 + $0x208] sm:$0xff] }
 0x257   : > { %3232 = vmatmul.mubr.f32.gmra.mrb[42].mxu0 %v793_v7  ;;  %v795_v13 = vmax.f32 %v689_v8, 0.0  ;;  %v3792_v7 = vpack.c.bf16 %v1380_v5, %v1379_v4  ;;  %v1382_v8 = vld [vmem:[#allocation5 + $0x218] sm:$0xff] }
 0x258   : > { %v794_v11 = vmax.f32 %v684_v10, 0.0  ;;  %v3159_v12 = vpop.f32.mrb[14].mxu1  ;;  %v3796_v9 = vpack.c.bf16 %v1382_v8, %v1381_v6  ;;  %v1383_v10 = vld [vmem:[#allocation5 + $0x220] sm:$0xff] }
 0x259   : > { %v699_v14 = vadd.f32 %v3159_v12, %v4433_v33  ;;  %v693_v15 = vpop.f32.mrb[15].mxu1  ;;  %3793 = vmatprep.subr.bf16.mxu0 %v3792_v7 }
 0x25a   : > { %v694_v16 = vadd.f32 %v4433_v33, %v693_v15  ;;  %3234 = vmatprep.mubr.f32.mxu0 %v794_v11  ;;  %v1384_v11 = vld [vmem:[#allocation5 + $0x228] sm:$0xff]  ;;  %3795 = vmatpush3.bf16.msra.mxu0 %v3792_v7  ;;  %v1387_v15 = vld [vmem:[#allocation5 + $0x240] sm:$0xff] }
 0x25b   : > { %3235 = vmatmul.mubr.f32.gmra.mrb[44].mxu0 %v795_v13  ;;  %v797_v19 = vmax.f32 %v699_v14, 0.0  ;;  %3797 = vmatprep.subr.bf16.mxu0 %v3796_v9  ;;  %v3800_v12 = vpack.c.bf16 %v1384_v11, %v1383_v10  ;;  %v1385_v13 = vld [vmem:[#allocation5 + $0x230] sm:$0xff] }
 0x25c   : > { %v796_v17 = vmax.f32 %v694_v16, 0.0  ;;  %v3162_v18 = vpop.f32.mrb[16].mxu1  ;;  %v1388_v16 = vld [vmem:[#allocation5 + $0x248] sm:$0xff] }
 0x25d   : > { %v709_v40 = vadd.f32 %v3162_v18, %v4433_v33  ;;  %v703_v20 = vpop.f32.mrb[17].mxu1  ;;  %v1389_v18 = vld [vmem:[#allocation5 + $0x250] sm:$0xff] }
 0x25e   : > { %v704_v21 = vadd.f32 %v4433_v33, %v703_v20  ;;  %3237 = vmatprep.mubr.f32.mxu0 %v796_v17  ;;  %3799 = vmatpush3.bf16.msra.mxu0 %v3796_v9  ;;  %v3808_v17 = vpack.c.bf16 %v1388_v16, %v1387_v15  ;;  %v1391_v20 = vld [vmem:[#allocation5 + $0x260] sm:$0xff] }
 0x25f   : > { %3238 = vmatmul.mubr.f32.gmra.mrb[46].mxu0 %v797_v19  ;;  %v799_v24 = vmax.f32 %v709_v40, 0.0  ;;  %3801 = vmatprep.subr.bf16.mxu0 %v3800_v12  ;;  %v1390_v19 = vld [vmem:[#allocation5 + $0x258] sm:$0xff] }
 0x260   : > { %v798_v22 = vmax.f32 %v704_v21, 0.0  ;;  %v3165_v23 = vpop.f32.mrb[18].mxu1  ;;  %v3812_v40 = vpack.c.bf16 %v1390_v19, %v1389_v18  ;;  %v1392_v21 = vld [vmem:[#allocation5 + $0x268] sm:$0xff] }
 0x261   : > { %v719_v25 = vadd.f32 %v3165_v23, %v4433_v33  ;;  %v713_v26 = vpop.f32.mrb[19].mxu1  ;;  %v1393_v23 = vld [vmem:[#allocation5 + $0x270] sm:$0xff] }
 0x262   : > { %v714_v27 = vadd.f32 %v4433_v33, %v713_v26  ;;  %3240 = vmatprep.mubr.f32.mxu0 %v798_v22  ;;  %3803 = vmatpush3.bf16.msra.mxu0 %v3800_v12  ;;  %v3816_v22 = vpack.c.bf16 %v1392_v21, %v1391_v20  ;;  %v4467_v26 = vld [vmem:[#allocation7 + $0x2] ss:$0 sm:$0xff] }
 0x263   : > { %3241 = vmatmul.mubr.f32.gmra.mrb[48].mxu0 %v799_v24  ;;  %v801_v30 = vmax.f32 %v719_v25, 0.0  ;;  %v1394_v24 = vld [vmem:[#allocation5 + $0x278] sm:$0xff] }
 0x264   : > { %v800_v28 = vmax.f32 %v714_v27, 0.0  ;;  %v3168_v29 = vpop.f32.mrb[20].mxu1  ;;  %v3820_v25 = vpack.c.bf16 %v1394_v24, %v1393_v23 }
 0x265   : > { %v729_v31 = vadd.f32 %v3168_v29, %v4433_v33  ;;  %v723_v32 = vpop.f32.mrb[21].mxu1 }
 0x266   : > { %v724_v34 = vadd.f32 %v4433_v33, %v723_v32  ;;  %3243 = vmatprep.mubr.f32.mxu0 %v800_v28 }
 0x267   : > { %3244 = vmatmul.mubr.f32.gmra.mrb[50].mxu0 %v801_v30  ;;  %v803_v37 = vmax.f32 %v729_v31, 0.0 }
 0x268   : > { %v802_v35 = vmax.f32 %v724_v34, 0.0  ;;  %v3171_v36 = vpop.f32.mrb[22].mxu1 }
 0x269   : > { %v739_v38 = vadd.f32 %v3171_v36, %v4433_v33  ;;  %v733_v39 = vpop.f32.mrb[23].mxu1 }
 0x26a   : > { %v734_v41 = vadd.f32 %v4433_v33, %v733_v39  ;;  %3246 = vmatprep.mubr.f32.mxu0 %v802_v35 }
 0x26b   : > { %3247 = vmatmul.mubr.f32.gmra.mrb[52].mxu0 %v803_v37  ;;  %v805_v44 = vmax.f32 %v739_v38, 0.0 }
 0x26c   : > { %v804_v42 = vmax.f32 %v734_v41, 0.0  ;;  %v3174_v43 = vpop.f32.mrb[24].mxu1 }
 0x26d   : > { %v749_v45 = vadd.f32 %v3174_v43, %v4433_v33  ;;  %v743_v46 = vpop.f32.mrb[25].mxu1 }
 0x26e   : > { %v744_v47 = vadd.f32 %v4433_v33, %v743_v46  ;;  %3249 = vmatprep.mubr.f32.mxu0 %v804_v42 }
 0x26f   : > { %3250 = vmatmul.mubr.f32.gmra.mrb[54].mxu0 %v805_v44  ;;  %v807_v50 = vmax.f32 %v749_v45, 0.0 }
 0x270   : > { %v806_v48 = vmax.f32 %v744_v47, 0.0  ;;  %v3177_v49 = vpop.f32.mrb[26].mxu1 }
 0x271   : > { %v759_v51 = vadd.f32 %v3177_v49, %v4433_v33  ;;  %v753_v52 = vpop.f32.mrb[27].mxu1 }
 0x272   : > { %v754_v53 = vadd.f32 %v4433_v33, %v753_v52  ;;  %3252 = vmatprep.mubr.f32.mxu0 %v806_v48 }
 0x273   : > { %3253 = vmatmul.mubr.f32.gmra.mrb[56].mxu0 %v807_v50  ;;  %v809_v56 = vmax.f32 %v759_v51, 0.0 }
 0x274   : > { %v808_v54 = vmax.f32 %v754_v53, 0.0  ;;  %v3180_v55 = vpop.f32.mrb[28].mxu1 }
 0x275   : > { %v769_v57 = vadd.f32 %v3180_v55, %v4433_v33  ;;  %v763_v58 = vpop.f32.mrb[29].mxu1 }
 0x276   : > { %v764_v59 = vadd.f32 %v4433_v33, %v763_v58  ;;  %3255 = vmatprep.mubr.f32.mxu0 %v808_v54 }
 0x277   : > { %3256 = vmatmul.mubr.f32.gmra.mrb[58].mxu0 %v809_v56  ;;  %v811_v62 = vmax.f32 %v769_v57, 0.0 }
 0x278   : > { %v810_v60 = vmax.f32 %v764_v59, 0.0  ;;  %v3183_v61 = vpop.f32.mrb[30].mxu1 }
 0x279   : > { %v779_v63 = vadd.f32 %v3183_v61, %v4433_v33  ;;  %v773_v0 = vpop.f32.mrb[31].mxu1 }
 0x27a   : > { %v774_v1 = vadd.f32 %v4433_v33, %v773_v0  ;;  %3258 = vmatprep.mubr.f32.mxu0 %v810_v60  ;;  %v1386_v33 = vld [vmem:[#allocation5 + $0x238] sm:$0xff] }
 0x27b   : > { %3259 = vmatmul.mubr.f32.gmra.mrb[60].mxu0 %v811_v62  ;;  %v813_v3 = vmax.f32 %v779_v63, 0.0  ;;  %v3804_v14 = vpack.c.bf16 %v1386_v33, %v1385_v13 }
 0x27c   : > { %v812_v2 = vmax.f32 %v774_v1, 0.0 }
 0x27d   : > { %3805 = vmatprep.subr.bf16.mxu0 %v3804_v14 }
 0x27e   : > { %3261 = vmatprep.mubr.f32.mxu0 %v812_v2  ;;  %3807 = vmatpush3.bf16.msra.mxu0 %v3804_v14 }
 0x27f   : > { %3262 = vmatmul.mubr.f32.gmra.mrb[62].mxu0 %v813_v3  ;;  %3809 = vmatprep.subr.bf16.mxu0 %v3808_v17 }
 0x282   : > { %3811 = vmatpush3.bf16.msra.mxu0 %v3808_v17 }
 0x283   : > { %3813 = vmatprep.subr.bf16.mxu0 %v3812_v40 }
 0x286   : > { %3815 = vmatpush3.bf16.msra.mxu0 %v3812_v40 }
 0x287   : > { %3817 = vmatprep.subr.bf16.mxu0 %v3816_v22 }
 0x28a   : > { %3819 = vmatpush3.bf16.msra.mxu0 %v3816_v22 }
 0x28b   : > { %3821 = vmatprep.subr.bf16.mxu0 %v3820_v25 }
 0x28e   : > { %3823 = vmatpush3.bf16.msra.mxu0 %v3820_v25 }
 0x316   : > { %v3218_v27 = vpop.f32.mrb[32].mxu0 }
 0x317   : > { %v911_v28 = vadd.f32 %v3218_v27, %v4467_v26  ;;  %v905_v29 = vpop.f32.mrb[33].mxu0 }
 0x318   : > { %v906_v30 = vadd.f32 %v4467_v26, %v905_v29 }
 0x319   : > { %v1065_v34 = vmax.f32 %v911_v28, 0.0 }
 0x31a   : > { %v1064_v31 = vmax.f32 %v906_v30, 0.0  ;;  %v3221_v32 = vpop.f32.mrb[34].mxu0 }
 0x31b   : > { %v921_v35 = vadd.f32 %v3221_v32, %v4467_v26  ;;  %v915_v36 = vpop.f32.mrb[35].mxu0 }
 0x31c   : > { %v916_v37 = vadd.f32 %v4467_v26, %v915_v36  ;;  %3296 = vmatprep.mubr.f32.mxu1 %v1064_v31 }
 0x31d   : > { %3297 = vmatmul.mubr.f32.vlgmr.msra.gmra.mrb[32].mxu1 %v1065_v34  ;;  %v1067_v41 = vmax.f32 %v921_v35, 0.0 }
 0x31e   : > { %v1066_v38 = vmax.f32 %v916_v37, 0.0  ;;  %v3224_v39 = vpop.f32.mrb[36].mxu0 }
 0x31f   : > { %v931_v42 = vadd.f32 %v3224_v39, %v4467_v26  ;;  %v925_v43 = vpop.f32.mrb[37].mxu0 }
 0x320   : > { %v926_v44 = vadd.f32 %v4467_v26, %v925_v43  ;;  %3299 = vmatprep.mubr.f32.mxu1 %v1066_v38 }
 0x321   : > { %3300 = vmatmul.mubr.f32.gmra.mrb[34].mxu1 %v1067_v41  ;;  %v1069_v47 = vmax.f32 %v931_v42, 0.0 }
 0x322   : > { %v1068_v45 = vmax.f32 %v926_v44, 0.0  ;;  %v3227_v46 = vpop.f32.mrb[38].mxu0 }
 0x323   : > { %v941_v48 = vadd.f32 %v3227_v46, %v4467_v26  ;;  %v935_v49 = vpop.f32.mrb[39].mxu0 }
 0x324   : > { %v936_v50 = vadd.f32 %v4467_v26, %v935_v49  ;;  %3302 = vmatprep.mubr.f32.mxu1 %v1068_v45 }
 0x325   : > { %3303 = vmatmul.mubr.f32.gmra.mrb[36].mxu1 %v1069_v47  ;;  %v1071_v53 = vmax.f32 %v941_v48, 0.0 }
 0x326   : > { %v1070_v51 = vmax.f32 %v936_v50, 0.0  ;;  %v3230_v52 = vpop.f32.mrb[40].mxu0 }
 0x327   : > { %v951_v54 = vadd.f32 %v3230_v52, %v4467_v26  ;;  %v945_v55 = vpop.f32.mrb[41].mxu0 }
 0x328   : > { %v946_v56 = vadd.f32 %v4467_v26, %v945_v55  ;;  %3305 = vmatprep.mubr.f32.mxu1 %v1070_v51 }
 0x329   : > { %3306 = vmatmul.mubr.f32.gmra.mrb[38].mxu1 %v1071_v53  ;;  %v1073_v59 = vmax.f32 %v951_v54, 0.0 }
 0x32a   : > { %v1072_v57 = vmax.f32 %v946_v56, 0.0  ;;  %v3233_v58 = vpop.f32.mrb[42].mxu0 }
 0x32b   : > { %v961_v60 = vadd.f32 %v3233_v58, %v4467_v26  ;;  %v955_v61 = vpop.f32.mrb[43].mxu0 }
 0x32c   : > { %v956_v62 = vadd.f32 %v4467_v26, %v955_v61  ;;  %3308 = vmatprep.mubr.f32.mxu1 %v1072_v57 }
 0x32d   : > { %3309 = vmatmul.mubr.f32.gmra.mrb[40].mxu1 %v1073_v59  ;;  %v1075_v1 = vmax.f32 %v961_v60, 0.0 }
 0x32e   : > { %v1074_v63 = vmax.f32 %v956_v62, 0.0  ;;  %v3236_v0 = vpop.f32.mrb[44].mxu0  ;;  %v1661_v62 = vld [vmem:[#allocation5 + $0x280] sm:$0xff] }
 0x32f   : > { %v971_v2 = vadd.f32 %v3236_v0, %v4467_v26  ;;  %v965_v3 = vpop.f32.mrb[45].mxu0  ;;  %v1663_v0 = vld [vmem:[#allocation5 + $0x290] sm:$0xff] }
 0x330   : > { %v966_v4 = vadd.f32 %v4467_v26, %v965_v3  ;;  %3311 = vmatprep.mubr.f32.mxu1 %v1074_v63  ;;  %v1662_v63 = vld [vmem:[#allocation5 + $0x288] sm:$0xff] }
 0x331   : > { %3312 = vmatmul.mubr.f32.gmra.mrb[42].mxu1 %v1075_v1  ;;  %v1077_v7 = vmax.f32 %v971_v2, 0.0  ;;  %v3824_v1 = vpack.c.bf16 %v1662_v63, %v1661_v62  ;;  %v1664_v2 = vld [vmem:[#allocation5 + $0x298] sm:$0xff] }
 0x332   : > { %v1076_v5 = vmax.f32 %v966_v4, 0.0  ;;  %v3239_v6 = vpop.f32.mrb[46].mxu0  ;;  %v3828_v3 = vpack.c.bf16 %v1664_v2, %v1663_v0  ;;  %v1665_v4 = vld [vmem:[#allocation5 + $0x2a0] sm:$0xff] }
 0x333   : > { %v981_v8 = vadd.f32 %v3239_v6, %v4467_v26  ;;  %v975_v9 = vpop.f32.mrb[47].mxu0  ;;  %3825 = vmatprep.subr.bf16.mxu1 %v3824_v1 }
 0x334   : > { %v976_v10 = vadd.f32 %v4467_v26, %v975_v9  ;;  %3314 = vmatprep.mubr.f32.mxu1 %v1076_v5  ;;  %v1666_v5 = vld [vmem:[#allocation5 + $0x2a8] sm:$0xff]  ;;  %3827 = vmatpush3.bf16.msra.mxu1 %v3824_v1  ;;  %v1669_v9 = vld [vmem:[#allocation5 + $0x2c0] sm:$0xff] }
 0x335   : > { %3315 = vmatmul.mubr.f32.gmra.mrb[44].mxu1 %v1077_v7  ;;  %v1079_v13 = vmax.f32 %v981_v8, 0.0  ;;  %3829 = vmatprep.subr.bf16.mxu1 %v3828_v3  ;;  %v3832_v6 = vpack.c.bf16 %v1666_v5, %v1665_v4  ;;  %v1667_v7 = vld [vmem:[#allocation5 + $0x2b0] sm:$0xff] }
 0x336   : > { %v1078_v11 = vmax.f32 %v976_v10, 0.0  ;;  %v3242_v12 = vpop.f32.mrb[48].mxu0  ;;  %v1670_v10 = vld [vmem:[#allocation5 + $0x2c8] sm:$0xff] }
 0x337   : > { %v991_v33 = vadd.f32 %v3242_v12, %v4467_v26  ;;  %v985_v14 = vpop.f32.mrb[49].mxu0  ;;  %v1671_v12 = vld [vmem:[#allocation5 + $0x2d0] sm:$0xff] }
 0x338   : > { %v986_v15 = vadd.f32 %v4467_v26, %v985_v14  ;;  %3317 = vmatprep.mubr.f32.mxu1 %v1078_v11  ;;  %3831 = vmatpush3.bf16.msra.mxu1 %v3828_v3  ;;  %v3840_v11 = vpack.c.bf16 %v1670_v10, %v1669_v9  ;;  %v1673_v14 = vld [vmem:[#allocation5 + $0x2e0] sm:$0xff] }
 0x339   : > { %3318 = vmatmul.mubr.f32.gmra.mrb[46].mxu1 %v1079_v13  ;;  %v1081_v18 = vmax.f32 %v991_v33, 0.0  ;;  %3833 = vmatprep.subr.bf16.mxu1 %v3832_v6  ;;  %v1672_v13 = vld [vmem:[#allocation5 + $0x2d8] sm:$0xff] }
 0x33a   : > { %v1080_v16 = vmax.f32 %v986_v15, 0.0  ;;  %v3245_v17 = vpop.f32.mrb[50].mxu0  ;;  %v3844_v33 = vpack.c.bf16 %v1672_v13, %v1671_v12  ;;  %v1674_v15 = vld [vmem:[#allocation5 + $0x2e8] sm:$0xff] }
 0x33b   : > { %v1001_v19 = vadd.f32 %v3245_v17, %v4467_v26  ;;  %v995_v40 = vpop.f32.mrb[51].mxu0  ;;  %v1675_v17 = vld [vmem:[#allocation5 + $0x2f0] sm:$0xff] }
 0x33c   : > { %v996_v20 = vadd.f32 %v4467_v26, %v995_v40  ;;  %3320 = vmatprep.mubr.f32.mxu1 %v1080_v16  ;;  %3835 = vmatpush3.bf16.msra.mxu1 %v3832_v6  ;;  %v3848_v16 = vpack.c.bf16 %v1674_v15, %v1673_v14  ;;  %v4501_v40 = vld [vmem:[#allocation7 + $0x3] ss:$0 sm:$0xff] }
 0x33d   : > { %3321 = vmatmul.mubr.f32.gmra.mrb[48].mxu1 %v1081_v18  ;;  %v1083_v23 = vmax.f32 %v1001_v19, 0.0  ;;  %v1676_v18 = vld [vmem:[#allocation5 + $0x2f8] sm:$0xff] }
 0x33e   : > { %v1082_v21 = vmax.f32 %v996_v20, 0.0  ;;  %v3248_v22 = vpop.f32.mrb[52].mxu0  ;;  %v3852_v19 = vpack.c.bf16 %v1676_v18, %v1675_v17 }
 0x33f   : > { %v1011_v24 = vadd.f32 %v3248_v22, %v4467_v26  ;;  %v1005_v25 = vpop.f32.mrb[53].mxu0 }
 0x340   : > { %v1006_v27 = vadd.f32 %v4467_v26, %v1005_v25  ;;  %3323 = vmatprep.mubr.f32.mxu1 %v1082_v21 }
 0x341   : > { %3324 = vmatmul.mubr.f32.gmra.mrb[50].mxu1 %v1083_v23  ;;  %v1085_v30 = vmax.f32 %v1011_v24, 0.0 }
 0x342   : > { %v1084_v28 = vmax.f32 %v1006_v27, 0.0  ;;  %v3251_v29 = vpop.f32.mrb[54].mxu0 }
 0x343   : > { %v1021_v31 = vadd.f32 %v3251_v29, %v4467_v26  ;;  %v1015_v32 = vpop.f32.mrb[55].mxu0 }
 0x344   : > { %v1016_v34 = vadd.f32 %v4467_v26, %v1015_v32  ;;  %3326 = vmatprep.mubr.f32.mxu1 %v1084_v28 }
 0x345   : > { %3327 = vmatmul.mubr.f32.gmra.mrb[52].mxu1 %v1085_v30  ;;  %v1087_v37 = vmax.f32 %v1021_v31, 0.0 }
 0x346   : > { %v1086_v35 = vmax.f32 %v1016_v34, 0.0  ;;  %v3254_v36 = vpop.f32.mrb[56].mxu0 }
 0x347   : > { %v1031_v38 = vadd.f32 %v3254_v36, %v4467_v26  ;;  %v1025_v39 = vpop.f32.mrb[57].mxu0 }
 0x348   : > { %v1026_v41 = vadd.f32 %v4467_v26, %v1025_v39  ;;  %3329 = vmatprep.mubr.f32.mxu1 %v1086_v35 }
 0x349   : > { %3330 = vmatmul.mubr.f32.gmra.mrb[54].mxu1 %v1087_v37  ;;  %v1089_v44 = vmax.f32 %v1031_v38, 0.0 }
 0x34a   : > { %v1088_v42 = vmax.f32 %v1026_v41, 0.0  ;;  %v3257_v43 = vpop.f32.mrb[58].mxu0 }
 0x34b   : > { %v1041_v45 = vadd.f32 %v3257_v43, %v4467_v26  ;;  %v1035_v46 = vpop.f32.mrb[59].mxu0 }
 0x34c   : > { %v1036_v47 = vadd.f32 %v4467_v26, %v1035_v46  ;;  %3332 = vmatprep.mubr.f32.mxu1 %v1088_v42 }
 0x34d   : > { %3333 = vmatmul.mubr.f32.gmra.mrb[56].mxu1 %v1089_v44  ;;  %v1091_v50 = vmax.f32 %v1041_v45, 0.0 }
 0x34e   : > { %v1090_v48 = vmax.f32 %v1036_v47, 0.0  ;;  %v3260_v49 = vpop.f32.mrb[60].mxu0 }
 0x34f   : > { %v1051_v51 = vadd.f32 %v3260_v49, %v4467_v26  ;;  %v1045_v52 = vpop.f32.mrb[61].mxu0 }
 0x350   : > { %v1046_v53 = vadd.f32 %v4467_v26, %v1045_v52  ;;  %3335 = vmatprep.mubr.f32.mxu1 %v1090_v48 }
 0x351   : > { %3336 = vmatmul.mubr.f32.gmra.mrb[58].mxu1 %v1091_v50  ;;  %v1093_v56 = vmax.f32 %v1051_v51, 0.0 }
 0x352   : > { %v1092_v54 = vmax.f32 %v1046_v53, 0.0  ;;  %v3263_v55 = vpop.f32.mrb[62].mxu0 }
 0x353   : > { %v1061_v57 = vadd.f32 %v3263_v55, %v4467_v26  ;;  %v1055_v58 = vpop.f32.mrb[63].mxu0 }
 0x354   : > { %v1056_v59 = vadd.f32 %v4467_v26, %v1055_v58  ;;  %3338 = vmatprep.mubr.f32.mxu1 %v1092_v54  ;;  %v1668_v26 = vld [vmem:[#allocation5 + $0x2b8] sm:$0xff] }
 0x355   : > { %3339 = vmatmul.mubr.f32.gmra.mrb[60].mxu1 %v1093_v56  ;;  %v1095_v61 = vmax.f32 %v1061_v57, 0.0  ;;  %v3836_v8 = vpack.c.bf16 %v1668_v26, %v1667_v7 }
 0x356   : > { %v1094_v60 = vmax.f32 %v1056_v59, 0.0 }
 0x357   : > { %3837 = vmatprep.subr.bf16.mxu1 %v3836_v8 }
 0x358   : > { %3341 = vmatprep.mubr.f32.mxu1 %v1094_v60  ;;  %3839 = vmatpush3.bf16.msra.mxu1 %v3836_v8 }
 0x359   : > { %3342 = vmatmul.mubr.f32.gmra.mrb[62].mxu1 %v1095_v61  ;;  %3841 = vmatprep.subr.bf16.mxu1 %v3840_v11 }
 0x35c   : > { %3843 = vmatpush3.bf16.msra.mxu1 %v3840_v11 }
 0x35d   : > { %3845 = vmatprep.subr.bf16.mxu1 %v3844_v33 }
 0x360   : > { %3847 = vmatpush3.bf16.msra.mxu1 %v3844_v33 }
 0x361   : > { %3849 = vmatprep.subr.bf16.mxu1 %v3848_v16 }
 0x364   : > { %3851 = vmatpush3.bf16.msra.mxu1 %v3848_v16 }
 0x365   : > { %3853 = vmatprep.subr.bf16.mxu1 %v3852_v19 }
 0x368   : > { %3855 = vmatpush3.bf16.msra.mxu1 %v3852_v19 }
 0x3f0   : > { %v3298_v20 = vpop.f32.mrb[32].mxu1 }
 0x3f1   : > { %v1193_v21 = vadd.f32 %v3298_v20, %v4501_v40  ;;  %v1187_v22 = vpop.f32.mrb[33].mxu1 }
 0x3f2   : > { %v1188_v23 = vadd.f32 %v4501_v40, %v1187_v22 }
 0x3f3   : > { %v1347_v27 = vmax.f32 %v1193_v21, 0.0 }
 0x3f4   : > { %v1346_v24 = vmax.f32 %v1188_v23, 0.0  ;;  %v3301_v25 = vpop.f32.mrb[34].mxu1 }
 0x3f5   : > { %v1203_v28 = vadd.f32 %v3301_v25, %v4501_v40  ;;  %v1197_v29 = vpop.f32.mrb[35].mxu1 }
 0x3f6   : > { %v1198_v30 = vadd.f32 %v4501_v40, %v1197_v29  ;;  %3376 = vmatprep.mubr.f32.mxu0 %v1346_v24 }
 0x3f7   : > { %3377 = vmatmul.mubr.f32.vlgmr.msra.gmra.mrb[64].mxu0 %v1347_v27  ;;  %v1349_v34 = vmax.f32 %v1203_v28, 0.0 }
 0x3f8   : > { %v1348_v31 = vmax.f32 %v1198_v30, 0.0  ;;  %v3304_v32 = vpop.f32.mrb[36].mxu1 }
 0x3f9   : > { %v1213_v35 = vadd.f32 %v3304_v32, %v4501_v40  ;;  %v1207_v36 = vpop.f32.mrb[37].mxu1 }
 0x3fa   : > { %v1208_v37 = vadd.f32 %v4501_v40, %v1207_v36  ;;  %3379 = vmatprep.mubr.f32.mxu0 %v1348_v31 }
 0x3fb   : > { %3380 = vmatmul.mubr.f32.gmra.mrb[66].mxu0 %v1349_v34  ;;  %v1351_v41 = vmax.f32 %v1213_v35, 0.0 }
 0x3fc   : > { %v1350_v38 = vmax.f32 %v1208_v37, 0.0  ;;  %v3307_v39 = vpop.f32.mrb[38].mxu1 }
 0x3fd   : > { %v1223_v42 = vadd.f32 %v3307_v39, %v4501_v40  ;;  %v1217_v43 = vpop.f32.mrb[39].mxu1 }
 0x3fe   : > { %v1218_v44 = vadd.f32 %v4501_v40, %v1217_v43  ;;  %3382 = vmatprep.mubr.f32.mxu0 %v1350_v38 }
 0x3ff   : > { %3383 = vmatmul.mubr.f32.gmra.mrb[68].mxu0 %v1351_v41  ;;  %v1353_v47 = vmax.f32 %v1223_v42, 0.0 }
 0x400   : > { %v1352_v45 = vmax.f32 %v1218_v44, 0.0  ;;  %v3310_v46 = vpop.f32.mrb[40].mxu1 }
 0x401   : > { %v1233_v48 = vadd.f32 %v3310_v46, %v4501_v40  ;;  %v1227_v49 = vpop.f32.mrb[41].mxu1 }
 0x402   : > { %v1228_v50 = vadd.f32 %v4501_v40, %v1227_v49  ;;  %3385 = vmatprep.mubr.f32.mxu0 %v1352_v45 }
 0x403   : > { %3386 = vmatmul.mubr.f32.gmra.mrb[70].mxu0 %v1353_v47  ;;  %v1355_v53 = vmax.f32 %v1233_v48, 0.0 }
 0x404   : > { %v1354_v51 = vmax.f32 %v1228_v50, 0.0  ;;  %v3313_v52 = vpop.f32.mrb[42].mxu1 }
 0x405   : > { %v1243_v54 = vadd.f32 %v3313_v52, %v4501_v40  ;;  %v1237_v55 = vpop.f32.mrb[43].mxu1 }
 0x406   : > { %v1238_v56 = vadd.f32 %v4501_v40, %v1237_v55  ;;  %3388 = vmatprep.mubr.f32.mxu0 %v1354_v51 }
 0x407   : > { %3389 = vmatmul.mubr.f32.gmra.mrb[72].mxu0 %v1355_v53  ;;  %v1357_v59 = vmax.f32 %v1243_v54, 0.0 }
 0x408   : > { %v1356_v57 = vmax.f32 %v1238_v56, 0.0  ;;  %v3316_v58 = vpop.f32.mrb[44].mxu1  ;;  %v1943_v56 = vld [vmem:[#allocation5 + $0x300] sm:$0xff] }
 0x409   : > { %v1253_v60 = vadd.f32 %v3316_v58, %v4501_v40  ;;  %v1247_v61 = vpop.f32.mrb[45].mxu1  ;;  %v1945_v58 = vld [vmem:[#allocation5 + $0x310] sm:$0xff] }
 0x40a   : > { %v1248_v62 = vadd.f32 %v4501_v40, %v1247_v61  ;;  %3391 = vmatprep.mubr.f32.mxu0 %v1356_v57  ;;  %v1944_v57 = vld [vmem:[#allocation5 + $0x308] sm:$0xff] }
 0x40b   : > { %3392 = vmatmul.mubr.f32.gmra.mrb[74].mxu0 %v1357_v59  ;;  %v1359_v1 = vmax.f32 %v1253_v60, 0.0  ;;  %v3856_v59 = vpack.c.bf16 %v1944_v57, %v1943_v56  ;;  %v1946_v60 = vld [vmem:[#allocation5 + $0x318] sm:$0xff] }
 0x40c   : > { %v1358_v63 = vmax.f32 %v1248_v62, 0.0  ;;  %v3319_v0 = vpop.f32.mrb[46].mxu1  ;;  %v3860_v61 = vpack.c.bf16 %v1946_v60, %v1945_v58  ;;  %v1947_v62 = vld [vmem:[#allocation5 + $0x320] sm:$0xff] }
 0x40d   : > { %v1263_v2 = vadd.f32 %v3319_v0, %v4501_v40  ;;  %v1257_v3 = vpop.f32.mrb[47].mxu1  ;;  %3857 = vmatprep.subr.bf16.mxu0 %v3856_v59 }
 0x40e   : > { %v1258_v4 = vadd.f32 %v4501_v40, %v1257_v3  ;;  %3394 = vmatprep.mubr.f32.mxu0 %v1358_v63  ;;  %v1948_v63 = vld [vmem:[#allocation5 + $0x328] sm:$0xff]  ;;  %3859 = vmatpush3.bf16.msra.mxu0 %v3856_v59  ;;  %v1951_v3 = vld [vmem:[#allocation5 + $0x340] sm:$0xff] }
 0x40f   : > { %3395 = vmatmul.mubr.f32.gmra.mrb[76].mxu0 %v1359_v1  ;;  %v1361_v7 = vmax.f32 %v1263_v2, 0.0  ;;  %3861 = vmatprep.subr.bf16.mxu0 %v3860_v61  ;;  %v3864_v0 = vpack.c.bf16 %v1948_v63, %v1947_v62  ;;  %v1949_v1 = vld [vmem:[#allocation5 + $0x330] sm:$0xff] }
 0x410   : > { %v1360_v5 = vmax.f32 %v1258_v4, 0.0  ;;  %v3322_v6 = vpop.f32.mrb[48].mxu1  ;;  %v1952_v4 = vld [vmem:[#allocation5 + $0x348] sm:$0xff] }
 0x411   : > { %v1273_v26 = vadd.f32 %v3322_v6, %v4501_v40  ;;  %v1267_v8 = vpop.f32.mrb[49].mxu1  ;;  %v1953_v6 = vld [vmem:[#allocation5 + $0x350] sm:$0xff] }
 0x412   : > { %v1268_v9 = vadd.f32 %v4501_v40, %v1267_v8  ;;  %3397 = vmatprep.mubr.f32.mxu0 %v1360_v5  ;;  %3863 = vmatpush3.bf16.msra.mxu0 %v3860_v61  ;;  %v3872_v5 = vpack.c.bf16 %v1952_v4, %v1951_v3  ;;  %v1955_v8 = vld [vmem:[#allocation5 + $0x360] sm:$0xff] }
 0x413   : > { %3398 = vmatmul.mubr.f32.gmra.mrb[78].mxu0 %v1361_v7  ;;  %v1363_v12 = vmax.f32 %v1273_v26, 0.0  ;;  %3865 = vmatprep.subr.bf16.mxu0 %v3864_v0  ;;  %v1954_v7 = vld [vmem:[#allocation5 + $0x358] sm:$0xff] }
 0x414   : > { %v1362_v10 = vmax.f32 %v1268_v9, 0.0  ;;  %v3325_v11 = vpop.f32.mrb[50].mxu1  ;;  %v3876_v26 = vpack.c.bf16 %v1954_v7, %v1953_v6  ;;  %v1956_v9 = vld [vmem:[#allocation5 + $0x368] sm:$0xff] }
 0x415   : > { %v1283_v13 = vadd.f32 %v3325_v11, %v4501_v40  ;;  %v1277_v33 = vpop.f32.mrb[51].mxu1  ;;  %v1957_v11 = vld [vmem:[#allocation5 + $0x370] sm:$0xff] }
 0x416   : > { %v1278_v14 = vadd.f32 %v4501_v40, %v1277_v33  ;;  %3400 = vmatprep.mubr.f32.mxu0 %v1362_v10  ;;  %3867 = vmatpush3.bf16.msra.mxu0 %v3864_v0  ;;  %v3880_v10 = vpack.c.bf16 %v1956_v9, %v1955_v8  ;;  %v4535_v33 = vld [vmem:[#allocation7 + $0x4] ss:$0 sm:$0xff] }
 0x417   : > { %3401 = vmatmul.mubr.f32.gmra.mrb[80].mxu0 %v1363_v12  ;;  %v1365_v17 = vmax.f32 %v1283_v13, 0.0  ;;  %v1958_v12 = vld [vmem:[#allocation5 + $0x378] sm:$0xff] }
 0x418   : > { %v1364_v15 = vmax.f32 %v1278_v14, 0.0  ;;  %v3328_v16 = vpop.f32.mrb[52].mxu1  ;;  %v3884_v13 = vpack.c.bf16 %v1958_v12, %v1957_v11 }
 0x419   : > { %v1293_v18 = vadd.f32 %v3328_v16, %v4501_v40  ;;  %v1287_v19 = vpop.f32.mrb[53].mxu1 }
 0x41a   : > { %v1288_v20 = vadd.f32 %v4501_v40, %v1287_v19  ;;  %3403 = vmatprep.mubr.f32.mxu0 %v1364_v15 }
 0x41b   : > { %3404 = vmatmul.mubr.f32.gmra.mrb[82].mxu0 %v1365_v17  ;;  %v1367_v23 = vmax.f32 %v1293_v18, 0.0 }
 0x41c   : > { %v1366_v21 = vmax.f32 %v1288_v20, 0.0  ;;  %v3331_v22 = vpop.f32.mrb[54].mxu1 }
 0x41d   : > { %v1303_v24 = vadd.f32 %v3331_v22, %v4501_v40  ;;  %v1297_v25 = vpop.f32.mrb[55].mxu1 }
 0x41e   : > { %v1298_v27 = vadd.f32 %v4501_v40, %v1297_v25  ;;  %3406 = vmatprep.mubr.f32.mxu0 %v1366_v21 }
 0x41f   : > { %3407 = vmatmul.mubr.f32.gmra.mrb[84].mxu0 %v1367_v23  ;;  %v1369_v30 = vmax.f32 %v1303_v24, 0.0 }
 0x420   : > { %v1368_v28 = vmax.f32 %v1298_v27, 0.0  ;;  %v3334_v29 = vpop.f32.mrb[56].mxu1 }
 0x421   : > { %v1313_v31 = vadd.f32 %v3334_v29, %v4501_v40  ;;  %v1307_v32 = vpop.f32.mrb[57].mxu1 }
 0x422   : > { %v1308_v34 = vadd.f32 %v4501_v40, %v1307_v32  ;;  %3409 = vmatprep.mubr.f32.mxu0 %v1368_v28 }
 0x423   : > { %3410 = vmatmul.mubr.f32.gmra.mrb[86].mxu0 %v1369_v30  ;;  %v1371_v37 = vmax.f32 %v1313_v31, 0.0 }
 0x424   : > { %v1370_v35 = vmax.f32 %v1308_v34, 0.0  ;;  %v3337_v36 = vpop.f32.mrb[58].mxu1 }
 0x425   : > { %v1323_v38 = vadd.f32 %v3337_v36, %v4501_v40  ;;  %v1317_v39 = vpop.f32.mrb[59].mxu1 }
 0x426   : > { %v1318_v41 = vadd.f32 %v4501_v40, %v1317_v39  ;;  %3412 = vmatprep.mubr.f32.mxu0 %v1370_v35 }
 0x427   : > { %3413 = vmatmul.mubr.f32.gmra.mrb[88].mxu0 %v1371_v37  ;;  %v1373_v44 = vmax.f32 %v1323_v38, 0.0 }
 0x428   : > { %v1372_v42 = vmax.f32 %v1318_v41, 0.0  ;;  %v3340_v43 = vpop.f32.mrb[60].mxu1 }
 0x429   : > { %v1333_v45 = vadd.f32 %v3340_v43, %v4501_v40  ;;  %v1327_v46 = vpop.f32.mrb[61].mxu1 }
 0x42a   : > { %v1328_v47 = vadd.f32 %v4501_v40, %v1327_v46  ;;  %3415 = vmatprep.mubr.f32.mxu0 %v1372_v42 }
 0x42b   : > { %3416 = vmatmul.mubr.f32.gmra.mrb[90].mxu0 %v1373_v44  ;;  %v1375_v50 = vmax.f32 %v1333_v45, 0.0 }
 0x42c   : > { %v1374_v48 = vmax.f32 %v1328_v47, 0.0  ;;  %v3343_v49 = vpop.f32.mrb[62].mxu1 }
 0x42d   : > { %v1343_v51 = vadd.f32 %v3343_v49, %v4501_v40  ;;  %v1337_v52 = vpop.f32.mrb[63].mxu1 }
 0x42e   : > { %v1338_v53 = vadd.f32 %v4501_v40, %v1337_v52  ;;  %3418 = vmatprep.mubr.f32.mxu0 %v1374_v48  ;;  %v1950_v40 = vld [vmem:[#allocation5 + $0x338] sm:$0xff] }
 0x42f   : > { %3419 = vmatmul.mubr.f32.gmra.mrb[92].mxu0 %v1375_v50  ;;  %v1377_v55 = vmax.f32 %v1343_v51, 0.0  ;;  %v3868_v2 = vpack.c.bf16 %v1950_v40, %v1949_v1 }
 0x430   : > { %v1376_v54 = vmax.f32 %v1338_v53, 0.0 }
 0x431   : > { %3869 = vmatprep.subr.bf16.mxu0 %v3868_v2 }
 0x432   : > { %3421 = vmatprep.mubr.f32.mxu0 %v1376_v54  ;;  %3871 = vmatpush3.bf16.msra.mxu0 %v3868_v2 }
 0x433   : > { %3422 = vmatmul.mubr.f32.gmra.mrb[94].mxu0 %v1377_v55  ;;  %3873 = vmatprep.subr.bf16.mxu0 %v3872_v5 }
 0x436   : > { %3875 = vmatpush3.bf16.msra.mxu0 %v3872_v5 }
 0x437   : > { %3877 = vmatprep.subr.bf16.mxu0 %v3876_v26 }
 0x43a   : > { %3879 = vmatpush3.bf16.msra.mxu0 %v3876_v26 }
 0x43b   : > { %3881 = vmatprep.subr.bf16.mxu0 %v3880_v10 }
 0x43e   : > { %3883 = vmatpush3.bf16.msra.mxu0 %v3880_v10 }
 0x43f   : > { %3885 = vmatprep.subr.bf16.mxu0 %v3884_v13 }
 0x442   : > { %3887 = vmatpush3.bf16.msra.mxu0 %v3884_v13 }
 0x4ca   : > { %v3378_v14 = vpop.f32.mrb[64].mxu0 }
 0x4cb   : > { %v1475_v15 = vadd.f32 %v3378_v14, %v4535_v33  ;;  %v1469_v16 = vpop.f32.mrb[65].mxu0 }
 0x4cc   : > { %v1470_v17 = vadd.f32 %v4535_v33, %v1469_v16 }
 0x4cd   : > { %v1629_v20 = vmax.f32 %v1475_v15, 0.0 }
 0x4ce   : > { %v1628_v18 = vmax.f32 %v1470_v17, 0.0  ;;  %v3381_v19 = vpop.f32.mrb[66].mxu0 }
 0x4cf   : > { %v1485_v21 = vadd.f32 %v3381_v19, %v4535_v33  ;;  %v1479_v22 = vpop.f32.mrb[67].mxu0 }
 0x4d0   : > { %v1480_v23 = vadd.f32 %v4535_v33, %v1479_v22  ;;  %3456 = vmatprep.mubr.f32.mxu1 %v1628_v18 }
 0x4d1   : > { %3457 = vmatmul.mubr.f32.vlgmr.msra.gmra.mrb[64].mxu1 %v1629_v20  ;;  %v1631_v27 = vmax.f32 %v1485_v21, 0.0 }
 0x4d2   : > { %v1630_v24 = vmax.f32 %v1480_v23, 0.0  ;;  %v3384_v25 = vpop.f32.mrb[68].mxu0 }
 0x4d3   : > { %v1495_v28 = vadd.f32 %v3384_v25, %v4535_v33  ;;  %v1489_v29 = vpop.f32.mrb[69].mxu0 }
 0x4d4   : > { %v1490_v30 = vadd.f32 %v4535_v33, %v1489_v29  ;;  %3459 = vmatprep.mubr.f32.mxu1 %v1630_v24 }
 0x4d5   : > { %3460 = vmatmul.mubr.f32.gmra.mrb[66].mxu1 %v1631_v27  ;;  %v1633_v34 = vmax.f32 %v1495_v28, 0.0 }
 0x4d6   : > { %v1632_v31 = vmax.f32 %v1490_v30, 0.0  ;;  %v3387_v32 = vpop.f32.mrb[70].mxu0 }
 0x4d7   : > { %v1505_v35 = vadd.f32 %v3387_v32, %v4535_v33  ;;  %v1499_v36 = vpop.f32.mrb[71].mxu0 }
 0x4d8   : > { %v1500_v37 = vadd.f32 %v4535_v33, %v1499_v36  ;;  %3462 = vmatprep.mubr.f32.mxu1 %v1632_v31 }
 0x4d9   : > { %3463 = vmatmul.mubr.f32.gmra.mrb[68].mxu1 %v1633_v34  ;;  %v1635_v41 = vmax.f32 %v1505_v35, 0.0 }
 0x4da   : > { %v1634_v38 = vmax.f32 %v1500_v37, 0.0  ;;  %v3390_v39 = vpop.f32.mrb[72].mxu0 }
 0x4db   : > { %v1515_v42 = vadd.f32 %v3390_v39, %v4535_v33  ;;  %v1509_v43 = vpop.f32.mrb[73].mxu0 }
 0x4dc   : > { %v1510_v44 = vadd.f32 %v4535_v33, %v1509_v43  ;;  %3465 = vmatprep.mubr.f32.mxu1 %v1634_v38 }
 0x4dd   : > { %3466 = vmatmul.mubr.f32.gmra.mrb[70].mxu1 %v1635_v41  ;;  %v1637_v47 = vmax.f32 %v1515_v42, 0.0 }
 0x4de   : > { %v1636_v45 = vmax.f32 %v1510_v44, 0.0  ;;  %v3393_v46 = vpop.f32.mrb[74].mxu0 }
 0x4df   : > { %v1525_v48 = vadd.f32 %v3393_v46, %v4535_v33  ;;  %v1519_v49 = vpop.f32.mrb[75].mxu0 }
 0x4e0   : > { %v1520_v50 = vadd.f32 %v4535_v33, %v1519_v49  ;;  %3468 = vmatprep.mubr.f32.mxu1 %v1636_v45 }
 0x4e1   : > { %3469 = vmatmul.mubr.f32.gmra.mrb[72].mxu1 %v1637_v47  ;;  %v1639_v53 = vmax.f32 %v1525_v48, 0.0 }
 0x4e2   : > { %v1638_v51 = vmax.f32 %v1520_v50, 0.0  ;;  %v3396_v52 = vpop.f32.mrb[76].mxu0  ;;  %v2225_v50 = vld [vmem:[#allocation5 + $0x380] sm:$0xff] }
 0x4e3   : > { %v1535_v54 = vadd.f32 %v3396_v52, %v4535_v33  ;;  %v1529_v55 = vpop.f32.mrb[77].mxu0  ;;  %v2227_v52 = vld [vmem:[#allocation5 + $0x390] sm:$0xff] }
 0x4e4   : > { %v1530_v56 = vadd.f32 %v4535_v33, %v1529_v55  ;;  %3471 = vmatprep.mubr.f32.mxu1 %v1638_v51  ;;  %v2226_v51 = vld [vmem:[#allocation5 + $0x388] sm:$0xff] }
 0x4e5   : > { %3472 = vmatmul.mubr.f32.gmra.mrb[74].mxu1 %v1639_v53  ;;  %v1641_v59 = vmax.f32 %v1535_v54, 0.0  ;;  %v3888_v53 = vpack.c.bf16 %v2226_v51, %v2225_v50  ;;  %v2228_v54 = vld [vmem:[#allocation5 + $0x398] sm:$0xff] }
 0x4e6   : > { %v1640_v57 = vmax.f32 %v1530_v56, 0.0  ;;  %v3399_v58 = vpop.f32.mrb[78].mxu0  ;;  %v3892_v55 = vpack.c.bf16 %v2228_v54, %v2227_v52  ;;  %v2229_v56 = vld [vmem:[#allocation5 + $0x3a0] sm:$0xff] }
 0x4e7   : > { %v1545_v60 = vadd.f32 %v3399_v58, %v4535_v33  ;;  %v1539_v61 = vpop.f32.mrb[79].mxu0  ;;  %3889 = vmatprep.subr.bf16.mxu1 %v3888_v53 }
 0x4e8   : > { %v1540_v62 = vadd.f32 %v4535_v33, %v1539_v61  ;;  %3474 = vmatprep.mubr.f32.mxu1 %v1640_v57  ;;  %v2230_v57 = vld [vmem:[#allocation5 + $0x3a8] sm:$0xff]  ;;  %3891 = vmatpush3.bf16.msra.mxu1 %v3888_v53  ;;  %v2233_v61 = vld [vmem:[#allocation5 + $0x3c0] sm:$0xff] }
 0x4e9   : > { %3475 = vmatmul.mubr.f32.gmra.mrb[76].mxu1 %v1641_v59  ;;  %v1643_v1 = vmax.f32 %v1545_v60, 0.0  ;;  %3893 = vmatprep.subr.bf16.mxu1 %v3892_v55  ;;  %v3896_v58 = vpack.c.bf16 %v2230_v57, %v2229_v56  ;;  %v2231_v59 = vld [vmem:[#allocation5 + $0x3b0] sm:$0xff] }
 0x4ea   : > { %v1642_v63 = vmax.f32 %v1540_v62, 0.0  ;;  %v3402_v0 = vpop.f32.mrb[80].mxu0  ;;  %v2234_v62 = vld [vmem:[#allocation5 + $0x3c8] sm:$0xff] }
 0x4eb   : > { %v1555_v40 = vadd.f32 %v3402_v0, %v4535_v33  ;;  %v1549_v2 = vpop.f32.mrb[81].mxu0  ;;  %v2235_v0 = vld [vmem:[#allocation5 + $0x3d0] sm:$0xff] }
 0x4ec   : > { %v1550_v3 = vadd.f32 %v4535_v33, %v1549_v2  ;;  %3477 = vmatprep.mubr.f32.mxu1 %v1642_v63  ;;  %3895 = vmatpush3.bf16.msra.mxu1 %v3892_v55  ;;  %v3904_v63 = vpack.c.bf16 %v2234_v62, %v2233_v61  ;;  %v2237_v2 = vld [vmem:[#allocation5 + $0x3e0] sm:$0xff] }
 0x4ed   : > { %3478 = vmatmul.mubr.f32.gmra.mrb[78].mxu1 %v1643_v1  ;;  %v1645_v6 = vmax.f32 %v1555_v40, 0.0  ;;  %3897 = vmatprep.subr.bf16.mxu1 %v3896_v58  ;;  %v2236_v1 = vld [vmem:[#allocation5 + $0x3d8] sm:$0xff] }
 0x4ee   : > { %v1644_v4 = vmax.f32 %v1550_v3, 0.0  ;;  %v3405_v5 = vpop.f32.mrb[82].mxu0  ;;  %v3908_v40 = vpack.c.bf16 %v2236_v1, %v2235_v0  ;;  %v2238_v3 = vld [vmem:[#allocation5 + $0x3e8] sm:$0xff] }
 0x4ef   : > { %v1565_v7 = vadd.f32 %v3405_v5, %v4535_v33  ;;  %v1559_v26 = vpop.f32.mrb[83].mxu0  ;;  %v2239_v5 = vld [vmem:[#allocation5 + $0x3f0] sm:$0xff] }
 0x4f0   : > { %v1560_v8 = vadd.f32 %v4535_v33, %v1559_v26  ;;  %3480 = vmatprep.mubr.f32.mxu1 %v1644_v4  ;;  %3899 = vmatpush3.bf16.msra.mxu1 %v3896_v58  ;;  %v3912_v4 = vpack.c.bf16 %v2238_v3, %v2237_v2  ;;  %v4569_v26 = vld [vmem:[#allocation7 + $0x5] ss:$0 sm:$0xff] }
 0x4f1   : > { %3481 = vmatmul.mubr.f32.gmra.mrb[80].mxu1 %v1645_v6  ;;  %v1647_v11 = vmax.f32 %v1565_v7, 0.0  ;;  %v2240_v6 = vld [vmem:[#allocation5 + $0x3f8] sm:$0xff] }
 0x4f2   : > { %v1646_v9 = vmax.f32 %v1560_v8, 0.0  ;;  %v3408_v10 = vpop.f32.mrb[84].mxu0  ;;  %v3916_v7 = vpack.c.bf16 %v2240_v6, %v2239_v5 }
 0x4f3   : > { %v1575_v12 = vadd.f32 %v3408_v10, %v4535_v33  ;;  %v1569_v13 = vpop.f32.mrb[85].mxu0 }
 0x4f4   : > { %v1570_v14 = vadd.f32 %v4535_v33, %v1569_v13  ;;  %3483 = vmatprep.mubr.f32.mxu1 %v1646_v9 }
 0x4f5   : > { %3484 = vmatmul.mubr.f32.gmra.mrb[82].mxu1 %v1647_v11  ;;  %v1649_v17 = vmax.f32 %v1575_v12, 0.0 }
 0x4f6   : > { %v1648_v15 = vmax.f32 %v1570_v14, 0.0  ;;  %v3411_v16 = vpop.f32.mrb[86].mxu0 }
 0x4f7   : > { %v1585_v18 = vadd.f32 %v3411_v16, %v4535_v33  ;;  %v1579_v19 = vpop.f32.mrb[87].mxu0 }
 0x4f8   : > { %v1580_v20 = vadd.f32 %v4535_v33, %v1579_v19  ;;  %3486 = vmatprep.mubr.f32.mxu1 %v1648_v15 }
 0x4f9   : > { %3487 = vmatmul.mubr.f32.gmra.mrb[84].mxu1 %v1649_v17  ;;  %v1651_v23 = vmax.f32 %v1585_v18, 0.0 }
 0x4fa   : > { %v1650_v21 = vmax.f32 %v1580_v20, 0.0  ;;  %v3414_v22 = vpop.f32.mrb[88].mxu0 }
 0x4fb   : > { %v1595_v24 = vadd.f32 %v3414_v22, %v4535_v33  ;;  %v1589_v25 = vpop.f32.mrb[89].mxu0 }
 0x4fc   : > { %v1590_v27 = vadd.f32 %v4535_v33, %v1589_v25  ;;  %3489 = vmatprep.mubr.f32.mxu1 %v1650_v21 }
 0x4fd   : > { %3490 = vmatmul.mubr.f32.gmra.mrb[86].mxu1 %v1651_v23  ;;  %v1653_v30 = vmax.f32 %v1595_v24, 0.0 }
 0x4fe   : > { %v1652_v28 = vmax.f32 %v1590_v27, 0.0  ;;  %v3417_v29 = vpop.f32.mrb[90].mxu0 }
 0x4ff   : > { %v1605_v31 = vadd.f32 %v3417_v29, %v4535_v33  ;;  %v1599_v32 = vpop.f32.mrb[91].mxu0 }
 0x500   : > { %v1600_v34 = vadd.f32 %v4535_v33, %v1599_v32  ;;  %3492 = vmatprep.mubr.f32.mxu1 %v1652_v28 }
 0x501   : > { %3493 = vmatmul.mubr.f32.gmra.mrb[88].mxu1 %v1653_v30  ;;  %v1655_v37 = vmax.f32 %v1605_v31, 0.0 }
 0x502   : > { %v1654_v35 = vmax.f32 %v1600_v34, 0.0  ;;  %v3420_v36 = vpop.f32.mrb[92].mxu0 }
 0x503   : > { %v1615_v38 = vadd.f32 %v3420_v36, %v4535_v33  ;;  %v1609_v39 = vpop.f32.mrb[93].mxu0 }
 0x504   : > { %v1610_v41 = vadd.f32 %v4535_v33, %v1609_v39  ;;  %3495 = vmatprep.mubr.f32.mxu1 %v1654_v35 }
 0x505   : > { %3496 = vmatmul.mubr.f32.gmra.mrb[90].mxu1 %v1655_v37  ;;  %v1657_v44 = vmax.f32 %v1615_v38, 0.0 }
 0x506   : > { %v1656_v42 = vmax.f32 %v1610_v41, 0.0  ;;  %v3423_v43 = vpop.f32.mrb[94].mxu0 }
 0x507   : > { %v1625_v45 = vadd.f32 %v3423_v43, %v4535_v33  ;;  %v1619_v46 = vpop.f32.mrb[95].mxu0 }
 0x508   : > { %v1620_v47 = vadd.f32 %v4535_v33, %v1619_v46  ;;  %3498 = vmatprep.mubr.f32.mxu1 %v1656_v42  ;;  %v2232_v33 = vld [vmem:[#allocation5 + $0x3b8] sm:$0xff] }
 0x509   : > { %3499 = vmatmul.mubr.f32.gmra.mrb[92].mxu1 %v1657_v44  ;;  %v1659_v49 = vmax.f32 %v1625_v45, 0.0  ;;  %v3900_v60 = vpack.c.bf16 %v2232_v33, %v2231_v59 }
 0x50a   : > { %v1658_v48 = vmax.f32 %v1620_v47, 0.0 }
 0x50b   : > { %3901 = vmatprep.subr.bf16.mxu1 %v3900_v60 }
 0x50c   : > { %3501 = vmatprep.mubr.f32.mxu1 %v1658_v48  ;;  %3903 = vmatpush3.bf16.msra.mxu1 %v3900_v60 }
 0x50d   : > { %3502 = vmatmul.mubr.f32.gmra.mrb[94].mxu1 %v1659_v49  ;;  %3905 = vmatprep.subr.bf16.mxu1 %v3904_v63 }
 0x510   : > { %3907 = vmatpush3.bf16.msra.mxu1 %v3904_v63 }
 0x511   : > { %3909 = vmatprep.subr.bf16.mxu1 %v3908_v40 }
 0x514   : > { %3911 = vmatpush3.bf16.msra.mxu1 %v3908_v40 }
 0x515   : > { %3913 = vmatprep.subr.bf16.mxu1 %v3912_v4 }
 0x518   : > { %3915 = vmatpush3.bf16.msra.mxu1 %v3912_v4 }
 0x519   : > { %3917 = vmatprep.subr.bf16.mxu1 %v3916_v7 }
 0x51c   : > { %3919 = vmatpush3.bf16.msra.mxu1 %v3916_v7 }
 0x5a4   : > { %v3458_v8 = vpop.f32.mrb[64].mxu1 }
 0x5a5   : > { %v1757_v9 = vadd.f32 %v3458_v8, %v4569_v26  ;;  %v1751_v10 = vpop.f32.mrb[65].mxu1 }
 0x5a6   : > { %v1752_v11 = vadd.f32 %v4569_v26, %v1751_v10 }
 0x5a7   : > { %v1911_v14 = vmax.f32 %v1757_v9, 0.0 }
 0x5a8   : > { %v1910_v12 = vmax.f32 %v1752_v11, 0.0  ;;  %v3461_v13 = vpop.f32.mrb[66].mxu1 }
 0x5a9   : > { %v1767_v15 = vadd.f32 %v3461_v13, %v4569_v26  ;;  %v1761_v16 = vpop.f32.mrb[67].mxu1 }
 0x5aa   : > { %v1762_v17 = vadd.f32 %v4569_v26, %v1761_v16  ;;  %3536 = vmatprep.mubr.f32.mxu0 %v1910_v12 }
 0x5ab   : > { %3537 = vmatmul.mubr.f32.vlgmr.msra.gmra.mrb[96].mxu0 %v1911_v14  ;;  %v1913_v20 = vmax.f32 %v1767_v15, 0.0 }
 0x5ac   : > { %v1912_v18 = vmax.f32 %v1762_v17, 0.0  ;;  %v3464_v19 = vpop.f32.mrb[68].mxu1 }
 0x5ad   : > { %v1777_v21 = vadd.f32 %v3464_v19, %v4569_v26  ;;  %v1771_v22 = vpop.f32.mrb[69].mxu1 }
 0x5ae   : > { %v1772_v23 = vadd.f32 %v4569_v26, %v1771_v22  ;;  %3539 = vmatprep.mubr.f32.mxu0 %v1912_v18 }
 0x5af   : > { %3540 = vmatmul.mubr.f32.gmra.mrb[98].mxu0 %v1913_v20  ;;  %v1915_v27 = vmax.f32 %v1777_v21, 0.0 }
 0x5b0   : > { %v1914_v24 = vmax.f32 %v1772_v23, 0.0  ;;  %v3467_v25 = vpop.f32.mrb[70].mxu1 }
 0x5b1   : > { %v1787_v28 = vadd.f32 %v3467_v25, %v4569_v26  ;;  %v1781_v29 = vpop.f32.mrb[71].mxu1 }
 0x5b2   : > { %v1782_v30 = vadd.f32 %v4569_v26, %v1781_v29  ;;  %3542 = vmatprep.mubr.f32.mxu0 %v1914_v24 }
 0x5b3   : > { %3543 = vmatmul.mubr.f32.gmra.mrb[100].mxu0 %v1915_v27  ;;  %v1917_v34 = vmax.f32 %v1787_v28, 0.0 }
 0x5b4   : > { %v1916_v31 = vmax.f32 %v1782_v30, 0.0  ;;  %v3470_v32 = vpop.f32.mrb[72].mxu1 }
 0x5b5   : > { %v1797_v35 = vadd.f32 %v3470_v32, %v4569_v26  ;;  %v1791_v36 = vpop.f32.mrb[73].mxu1 }
 0x5b6   : > { %v1792_v37 = vadd.f32 %v4569_v26, %v1791_v36  ;;  %3545 = vmatprep.mubr.f32.mxu0 %v1916_v31 }
 0x5b7   : > { %3546 = vmatmul.mubr.f32.gmra.mrb[102].mxu0 %v1917_v34  ;;  %v1919_v41 = vmax.f32 %v1797_v35, 0.0 }
 0x5b8   : > { %v1918_v38 = vmax.f32 %v1792_v37, 0.0  ;;  %v3473_v39 = vpop.f32.mrb[74].mxu1 }
 0x5b9   : > { %v1807_v42 = vadd.f32 %v3473_v39, %v4569_v26  ;;  %v1801_v43 = vpop.f32.mrb[75].mxu1 }
 0x5ba   : > { %v1802_v44 = vadd.f32 %v4569_v26, %v1801_v43  ;;  %3548 = vmatprep.mubr.f32.mxu0 %v1918_v38 }
 0x5bb   : > { %3549 = vmatmul.mubr.f32.gmra.mrb[104].mxu0 %v1919_v41  ;;  %v1921_v47 = vmax.f32 %v1807_v42, 0.0 }
 0x5bc   : > { %v1920_v45 = vmax.f32 %v1802_v44, 0.0  ;;  %v3476_v46 = vpop.f32.mrb[76].mxu1  ;;  %v4603_v44 = vld [vmem:[#allocation7 + $0x6] ss:$0 sm:$0xff] }
 0x5bd   : > { %v1817_v48 = vadd.f32 %v3476_v46, %v4569_v26  ;;  %v1811_v49 = vpop.f32.mrb[77].mxu1 }
 0x5be   : > { %v1812_v50 = vadd.f32 %v4569_v26, %v1811_v49  ;;  %3551 = vmatprep.mubr.f32.mxu0 %v1920_v45 }
 0x5bf   : > { %3552 = vmatmul.mubr.f32.gmra.mrb[106].mxu0 %v1921_v47  ;;  %v1923_v53 = vmax.f32 %v1817_v48, 0.0 }
 0x5c0   : > { %v1922_v51 = vmax.f32 %v1812_v50, 0.0  ;;  %v3479_v52 = vpop.f32.mrb[78].mxu1 }
 0x5c1   : > { %v1827_v54 = vadd.f32 %v3479_v52, %v4569_v26  ;;  %v1821_v55 = vpop.f32.mrb[79].mxu1 }
 0x5c2   : > { %v1822_v56 = vadd.f32 %v4569_v26, %v1821_v55  ;;  %3554 = vmatprep.mubr.f32.mxu0 %v1922_v51 }
 0x5c3   : > { %3555 = vmatmul.mubr.f32.gmra.mrb[108].mxu0 %v1923_v53  ;;  %v1925_v59 = vmax.f32 %v1827_v54, 0.0 }
 0x5c4   : > { %v1924_v57 = vmax.f32 %v1822_v56, 0.0  ;;  %v3482_v58 = vpop.f32.mrb[80].mxu1 }
 0x5c5   : > { %v1837_v33 = vadd.f32 %v3482_v58, %v4569_v26  ;;  %v1831_v60 = vpop.f32.mrb[81].mxu1 }
 0x5c6   : > { %v1832_v61 = vadd.f32 %v4569_v26, %v1831_v60  ;;  %3557 = vmatprep.mubr.f32.mxu0 %v1924_v57 }
 0x5c7   : > { %3558 = vmatmul.mubr.f32.gmra.mrb[110].mxu0 %v1925_v59  ;;  %v1927_v0 = vmax.f32 %v1837_v33, 0.0 }
 0x5c8   : > { %v1926_v62 = vmax.f32 %v1832_v61, 0.0  ;;  %v3485_v63 = vpop.f32.mrb[82].mxu1 }
 0x5c9   : > { %v1847_v1 = vadd.f32 %v3485_v63, %v4569_v26  ;;  %v1841_v40 = vpop.f32.mrb[83].mxu1 }
 0x5ca   : > { %v1842_v2 = vadd.f32 %v4569_v26, %v1841_v40  ;;  %3560 = vmatprep.mubr.f32.mxu0 %v1926_v62 }
 0x5cb   : > { %3561 = vmatmul.mubr.f32.gmra.mrb[112].mxu0 %v1927_v0  ;;  %v1929_v5 = vmax.f32 %v1847_v1, 0.0 }
 0x5cc   : > { %v1928_v3 = vmax.f32 %v1842_v2, 0.0  ;;  %v3488_v4 = vpop.f32.mrb[84].mxu1 }
 0x5cd   : > { %v1857_v6 = vadd.f32 %v3488_v4, %v4569_v26  ;;  %v1851_v7 = vpop.f32.mrb[85].mxu1 }
 0x5ce   : > { %v1852_v8 = vadd.f32 %v4569_v26, %v1851_v7  ;;  %3563 = vmatprep.mubr.f32.mxu0 %v1928_v3 }
 0x5cf   : > { %3564 = vmatmul.mubr.f32.gmra.mrb[114].mxu0 %v1929_v5  ;;  %v1931_v11 = vmax.f32 %v1857_v6, 0.0 }
 0x5d0   : > { %v1930_v9 = vmax.f32 %v1852_v8, 0.0  ;;  %v3491_v10 = vpop.f32.mrb[86].mxu1 }
 0x5d1   : > { %v1867_v12 = vadd.f32 %v3491_v10, %v4569_v26  ;;  %v1861_v13 = vpop.f32.mrb[87].mxu1 }
 0x5d2   : > { %v1862_v14 = vadd.f32 %v4569_v26, %v1861_v13  ;;  %3566 = vmatprep.mubr.f32.mxu0 %v1930_v9 }
 0x5d3   : > { %3567 = vmatmul.mubr.f32.gmra.mrb[116].mxu0 %v1931_v11  ;;  %v1933_v17 = vmax.f32 %v1867_v12, 0.0 }
 0x5d4   : > { %v1932_v15 = vmax.f32 %v1862_v14, 0.0  ;;  %v3494_v16 = vpop.f32.mrb[88].mxu1 }
 0x5d5   : > { %v1877_v18 = vadd.f32 %v3494_v16, %v4569_v26  ;;  %v1871_v19 = vpop.f32.mrb[89].mxu1 }
 0x5d6   : > { %v1872_v20 = vadd.f32 %v4569_v26, %v1871_v19  ;;  %3569 = vmatprep.mubr.f32.mxu0 %v1932_v15 }
 0x5d7   : > { %3570 = vmatmul.mubr.f32.gmra.mrb[118].mxu0 %v1933_v17  ;;  %v1935_v23 = vmax.f32 %v1877_v18, 0.0 }
 0x5d8   : > { %v1934_v21 = vmax.f32 %v1872_v20, 0.0  ;;  %v3497_v22 = vpop.f32.mrb[90].mxu1 }
 0x5d9   : > { %v1887_v24 = vadd.f32 %v3497_v22, %v4569_v26  ;;  %v1881_v25 = vpop.f32.mrb[91].mxu1 }
 0x5da   : > { %v1882_v27 = vadd.f32 %v4569_v26, %v1881_v25  ;;  %3572 = vmatprep.mubr.f32.mxu0 %v1934_v21 }
 0x5db   : > { %3573 = vmatmul.mubr.f32.gmra.mrb[120].mxu0 %v1935_v23  ;;  %v1937_v30 = vmax.f32 %v1887_v24, 0.0 }
 0x5dc   : > { %v1936_v28 = vmax.f32 %v1882_v27, 0.0  ;;  %v3500_v29 = vpop.f32.mrb[92].mxu1 }
 0x5dd   : > { %v1897_v31 = vadd.f32 %v3500_v29, %v4569_v26  ;;  %v1891_v32 = vpop.f32.mrb[93].mxu1 }
 0x5de   : > { %v1892_v34 = vadd.f32 %v4569_v26, %v1891_v32  ;;  %3575 = vmatprep.mubr.f32.mxu0 %v1936_v28 }
 0x5df   : > { %3576 = vmatmul.mubr.f32.gmra.mrb[122].mxu0 %v1937_v30  ;;  %v1939_v37 = vmax.f32 %v1897_v31, 0.0 }
 0x5e0   : > { %v1938_v35 = vmax.f32 %v1892_v34, 0.0  ;;  %v3503_v36 = vpop.f32.mrb[94].mxu1 }
 0x5e1   : > { %v1907_v38 = vadd.f32 %v3503_v36, %v4569_v26  ;;  %v1901_v39 = vpop.f32.mrb[95].mxu1 }
 0x5e2   : > { %v1902_v41 = vadd.f32 %v4569_v26, %v1901_v39  ;;  %3578 = vmatprep.mubr.f32.mxu0 %v1938_v35 }
 0x5e3   : > { %3579 = vmatmul.mubr.f32.gmra.mrb[124].mxu0 %v1939_v37  ;;  %v1941_v43 = vmax.f32 %v1907_v38, 0.0 }
 0x5e4   : > { %v1940_v42 = vmax.f32 %v1902_v41, 0.0 }
 0x5e6   : > { %3581 = vmatprep.mubr.f32.mxu0 %v1940_v42 }
 0x5e7   : > { %3582 = vmatmul.mubr.f32.gmra.mrb[126].mxu0 %v1941_v43 }
 0x67e   : > { %v3538_v45 = vpop.f32.mrb[96].mxu0 }
 0x67f   : > { %v2039_v46 = vadd.f32 %v3538_v45, %v4603_v44  ;;  %v2033_v47 = vpop.f32.mrb[97].mxu0 }
 0x680   : > { %v2034_v48 = vadd.f32 %v4603_v44, %v2033_v47 }
 0x681   : > { %v2193_v51 = vmax.f32 %v2039_v46, 0.0 }
 0x682   : > { %v2192_v49 = vmax.f32 %v2034_v48, 0.0  ;;  %v3541_v50 = vpop.f32.mrb[98].mxu0 }
 0x683   : > { %v2049_v52 = vadd.f32 %v3541_v50, %v4603_v44  ;;  %v2043_v26 = vpop.f32.mrb[99].mxu0 }
 0x684   : > { %v2044_v53 = vadd.f32 %v4603_v44, %v2043_v26  ;;  %3616 = vmatprep.mubr.f32.mxu1 %v2192_v49 }
 0x685   : > { %3617 = vmatmul.mubr.f32.vlgmr.msra.gmra.mrb[96].mxu1 %v2193_v51  ;;  %v2195_v56 = vmax.f32 %v2049_v52, 0.0 }
 0x686   : > { %v2194_v54 = vmax.f32 %v2044_v53, 0.0  ;;  %v3544_v55 = vpop.f32.mrb[100].mxu0 }
 0x687   : > { %v2059_v57 = vadd.f32 %v3544_v55, %v4603_v44  ;;  %v2053_v58 = vpop.f32.mrb[101].mxu0 }
 0x688   : > { %v2054_v59 = vadd.f32 %v4603_v44, %v2053_v58  ;;  %3619 = vmatprep.mubr.f32.mxu1 %v2194_v54 }
 0x689   : > { %3620 = vmatmul.mubr.f32.gmra.mrb[98].mxu1 %v2195_v56  ;;  %v2197_v61 = vmax.f32 %v2059_v57, 0.0 }
 0x68a   : > { %v2196_v33 = vmax.f32 %v2054_v59, 0.0  ;;  %v3547_v60 = vpop.f32.mrb[102].mxu0 }
 0x68b   : > { %v2069_v62 = vadd.f32 %v3547_v60, %v4603_v44  ;;  %v2063_v63 = vpop.f32.mrb[103].mxu0 }
 0x68c   : > { %v2064_v0 = vadd.f32 %v4603_v44, %v2063_v63  ;;  %3622 = vmatprep.mubr.f32.mxu1 %v2196_v33 }
 0x68d   : > { %3623 = vmatmul.mubr.f32.gmra.mrb[100].mxu1 %v2197_v61  ;;  %v2199_v2 = vmax.f32 %v2069_v62, 0.0 }
 0x68e   : > { %v2198_v1 = vmax.f32 %v2064_v0, 0.0  ;;  %v3550_v40 = vpop.f32.mrb[104].mxu0 }
 0x68f   : > { %v2079_v3 = vadd.f32 %v3550_v40, %v4603_v44  ;;  %v2073_v4 = vpop.f32.mrb[105].mxu0 }
 0x690   : > { %v2074_v5 = vadd.f32 %v4603_v44, %v2073_v4  ;;  %3625 = vmatprep.mubr.f32.mxu1 %v2198_v1 }
 0x691   : > { %3626 = vmatmul.mubr.f32.gmra.mrb[102].mxu1 %v2199_v2  ;;  %v2201_v8 = vmax.f32 %v2079_v3, 0.0 }
 0x692   : > { %v2200_v6 = vmax.f32 %v2074_v5, 0.0  ;;  %v3553_v7 = vpop.f32.mrb[106].mxu0 }
 0x693   : > { %v2089_v9 = vadd.f32 %v3553_v7, %v4603_v44  ;;  %v2083_v10 = vpop.f32.mrb[107].mxu0 }
 0x694   : > { %v2084_v11 = vadd.f32 %v4603_v44, %v2083_v10  ;;  %3628 = vmatprep.mubr.f32.mxu1 %v2200_v6 }
 0x695   : > { %3629 = vmatmul.mubr.f32.gmra.mrb[104].mxu1 %v2201_v8  ;;  %v2203_v14 = vmax.f32 %v2089_v9, 0.0 }
 0x696   : > { %v2202_v12 = vmax.f32 %v2084_v11, 0.0  ;;  %v3556_v13 = vpop.f32.mrb[108].mxu0  ;;  %v4637_v11 = vld [vmem:[#allocation7 + $0x7] ss:$0 sm:$0xff] }
 0x697   : > { %v2099_v15 = vadd.f32 %v3556_v13, %v4603_v44  ;;  %v2093_v16 = vpop.f32.mrb[109].mxu0 }
 0x698   : > { %v2094_v17 = vadd.f32 %v4603_v44, %v2093_v16  ;;  %3631 = vmatprep.mubr.f32.mxu1 %v2202_v12 }
 0x699   : > { %3632 = vmatmul.mubr.f32.gmra.mrb[106].mxu1 %v2203_v14  ;;  %v2205_v20 = vmax.f32 %v2099_v15, 0.0 }
 0x69a   : > { %v2204_v18 = vmax.f32 %v2094_v17, 0.0  ;;  %v3559_v19 = vpop.f32.mrb[110].mxu0 }
 0x69b   : > { %v2109_v21 = vadd.f32 %v3559_v19, %v4603_v44  ;;  %v2103_v22 = vpop.f32.mrb[111].mxu0 }
 0x69c   : > { %v2104_v23 = vadd.f32 %v4603_v44, %v2103_v22  ;;  %3634 = vmatprep.mubr.f32.mxu1 %v2204_v18 }
 0x69d   : > { %3635 = vmatmul.mubr.f32.gmra.mrb[108].mxu1 %v2205_v20  ;;  %v2207_v27 = vmax.f32 %v2109_v21, 0.0 }
 0x69e   : > { %v2206_v24 = vmax.f32 %v2104_v23, 0.0  ;;  %v3562_v25 = vpop.f32.mrb[112].mxu0 }
 0x69f   : > { %v2119_v28 = vadd.f32 %v3562_v25, %v4603_v44  ;;  %v2113_v29 = vpop.f32.mrb[113].mxu0 }
 0x6a0   : > { %v2114_v30 = vadd.f32 %v4603_v44, %v2113_v29  ;;  %3637 = vmatprep.mubr.f32.mxu1 %v2206_v24 }
 0x6a1   : > { %3638 = vmatmul.mubr.f32.gmra.mrb[110].mxu1 %v2207_v27  ;;  %v2209_v34 = vmax.f32 %v2119_v28, 0.0 }
 0x6a2   : > { %v2208_v31 = vmax.f32 %v2114_v30, 0.0  ;;  %v3565_v32 = vpop.f32.mrb[114].mxu0 }
 0x6a3   : > { %v2129_v35 = vadd.f32 %v3565_v32, %v4603_v44  ;;  %v2123_v36 = vpop.f32.mrb[115].mxu0 }
 0x6a4   : > { %v2124_v37 = vadd.f32 %v4603_v44, %v2123_v36  ;;  %3640 = vmatprep.mubr.f32.mxu1 %v2208_v31 }
 0x6a5   : > { %3641 = vmatmul.mubr.f32.gmra.mrb[112].mxu1 %v2209_v34  ;;  %v2211_v41 = vmax.f32 %v2129_v35, 0.0 }
 0x6a6   : > { %v2210_v38 = vmax.f32 %v2124_v37, 0.0  ;;  %v3568_v39 = vpop.f32.mrb[116].mxu0 }
 0x6a7   : > { %v2139_v42 = vadd.f32 %v3568_v39, %v4603_v44  ;;  %v2133_v43 = vpop.f32.mrb[117].mxu0 }
 0x6a8   : > { %v2134_v45 = vadd.f32 %v4603_v44, %v2133_v43  ;;  %3643 = vmatprep.mubr.f32.mxu1 %v2210_v38 }
 0x6a9   : > { %3644 = vmatmul.mubr.f32.gmra.mrb[114].mxu1 %v2211_v41  ;;  %v2213_v48 = vmax.f32 %v2139_v42, 0.0 }
 0x6aa   : > { %v2212_v46 = vmax.f32 %v2134_v45, 0.0  ;;  %v3571_v47 = vpop.f32.mrb[118].mxu0 }
 0x6ab   : > { %v2149_v49 = vadd.f32 %v3571_v47, %v4603_v44  ;;  %v2143_v50 = vpop.f32.mrb[119].mxu0 }
 0x6ac   : > { %v2144_v51 = vadd.f32 %v4603_v44, %v2143_v50  ;;  %3646 = vmatprep.mubr.f32.mxu1 %v2212_v46 }
 0x6ad   : > { %3647 = vmatmul.mubr.f32.gmra.mrb[116].mxu1 %v2213_v48  ;;  %v2215_v53 = vmax.f32 %v2149_v49, 0.0 }
 0x6ae   : > { %v2214_v52 = vmax.f32 %v2144_v51, 0.0  ;;  %v3574_v26 = vpop.f32.mrb[120].mxu0 }
 0x6af   : > { %v2159_v54 = vadd.f32 %v3574_v26, %v4603_v44  ;;  %v2153_v55 = vpop.f32.mrb[121].mxu0 }
 0x6b0   : > { %v2154_v56 = vadd.f32 %v4603_v44, %v2153_v55  ;;  %3649 = vmatprep.mubr.f32.mxu1 %v2214_v52 }
 0x6b1   : > { %3650 = vmatmul.mubr.f32.gmra.mrb[118].mxu1 %v2215_v53  ;;  %v2217_v59 = vmax.f32 %v2159_v54, 0.0 }
 0x6b2   : > { %v2216_v57 = vmax.f32 %v2154_v56, 0.0  ;;  %v3577_v58 = vpop.f32.mrb[122].mxu0 }
 0x6b3   : > { %v2169_v33 = vadd.f32 %v3577_v58, %v4603_v44  ;;  %v2163_v60 = vpop.f32.mrb[123].mxu0 }
 0x6b4   : > { %v2164_v61 = vadd.f32 %v4603_v44, %v2163_v60  ;;  %3652 = vmatprep.mubr.f32.mxu1 %v2216_v57 }
 0x6b5   : > { %3653 = vmatmul.mubr.f32.gmra.mrb[120].mxu1 %v2217_v59  ;;  %v2219_v0 = vmax.f32 %v2169_v33, 0.0 }
 0x6b6   : > { %v2218_v62 = vmax.f32 %v2164_v61, 0.0  ;;  %v3580_v63 = vpop.f32.mrb[124].mxu0 }
 0x6b7   : > { %v2179_v1 = vadd.f32 %v3580_v63, %v4603_v44  ;;  %v2173_v40 = vpop.f32.mrb[125].mxu0 }
 0x6b8   : > { %v2174_v2 = vadd.f32 %v4603_v44, %v2173_v40  ;;  %3655 = vmatprep.mubr.f32.mxu1 %v2218_v62 }
 0x6b9   : > { %3656 = vmatmul.mubr.f32.gmra.mrb[122].mxu1 %v2219_v0  ;;  %v2221_v5 = vmax.f32 %v2179_v1, 0.0 }
 0x6ba   : > { %v2220_v3 = vmax.f32 %v2174_v2, 0.0  ;;  %v3583_v4 = vpop.f32.mrb[126].mxu0 }
 0x6bb   : > { %v2189_v6 = vadd.f32 %v3583_v4, %v4603_v44  ;;  %v2183_v7 = vpop.f32.mrb[127].mxu0 }
 0x6bc   : > { %v2184_v8 = vadd.f32 %v4603_v44, %v2183_v7  ;;  %3658 = vmatprep.mubr.f32.mxu1 %v2220_v3 }
 0x6bd   : > { %3659 = vmatmul.mubr.f32.gmra.mrb[124].mxu1 %v2221_v5  ;;  %v2223_v10 = vmax.f32 %v2189_v6, 0.0 }
 0x6be   : > { %v2222_v9 = vmax.f32 %v2184_v8, 0.0 }
 0x6c0   : > { %3661 = vmatprep.mubr.f32.mxu1 %v2222_v9 }
 0x6c1   : > { %3662 = vmatmul.mubr.f32.gmra.mrb[126].mxu1 %v2223_v10 }
 0x758   : > { %v3618_v12 = vpop.f32.mrb[96].mxu1 }
 0x759   : > { %v2321_v13 = vadd.f32 %v3618_v12, %v4637_v11  ;;  %v2315_v14 = vpop.f32.mrb[97].mxu1 }
 0x75a   : > { %v2316_v15 = vadd.f32 %v4637_v11, %v2315_v14 }
 0x75b   : > { %2475 = vst [vmem:[%s4643_s18 + $0x8] sm:$0xff] %v2321_v13 }
 0x75c   : > { %2474 = vst [vmem:[%s4643_s18] sm:$0xff] %v2316_v15  ;;  %v3621_v44 = vpop.f32.mrb[98].mxu1 }
 0x75d   : > { %v2331_v16 = vadd.f32 %v3621_v44, %v4637_v11  ;;  %v2325_v17 = vpop.f32.mrb[99].mxu1 }
 0x75e   : > { %v2326_v18 = vadd.f32 %v4637_v11, %v2325_v17 }
 0x75f   : > { %2477 = vst [vmem:[%s4643_s18 + $0x18] sm:$0xff] %v2331_v16 }
 0x760   : > { %2476 = vst [vmem:[%s4643_s18 + $0x10] sm:$0xff] %v2326_v18  ;;  %v3624_v19 = vpop.f32.mrb[100].mxu1 }
 0x761   : > { %v2341_v20 = vadd.f32 %v3624_v19, %v4637_v11  ;;  %v2335_v21 = vpop.f32.mrb[101].mxu1 }
 0x762   : > { %v2336_v22 = vadd.f32 %v4637_v11, %v2335_v21 }
 0x763   : > { %2479 = vst [vmem:[%s4643_s18 + $0x28] sm:$0xff] %v2341_v20 }
 0x764   : > { %2478 = vst [vmem:[%s4643_s18 + $0x20] sm:$0xff] %v2336_v22  ;;  %v3627_v23 = vpop.f32.mrb[102].mxu1 }
 0x765   : > { %v2351_v24 = vadd.f32 %v3627_v23, %v4637_v11  ;;  %v2345_v25 = vpop.f32.mrb[103].mxu1 }
 0x766   : > { %v2346_v27 = vadd.f32 %v4637_v11, %v2345_v25 }
 0x767   : > { %2481 = vst [vmem:[%s4643_s18 + $0x38] sm:$0xff] %v2351_v24 }
 0x768   : > { %2480 = vst [vmem:[%s4643_s18 + $0x30] sm:$0xff] %v2346_v27  ;;  %v3630_v28 = vpop.f32.mrb[104].mxu1 }
 0x769   : > { %v2361_v29 = vadd.f32 %v3630_v28, %v4637_v11  ;;  %v2355_v30 = vpop.f32.mrb[105].mxu1 }
 0x76a   : > { %v2356_v31 = vadd.f32 %v4637_v11, %v2355_v30 }
 0x76b   : > { %2483 = vst [vmem:[%s4643_s18 + $0x48] sm:$0xff] %v2361_v29 }
 0x76c   : > { %2482 = vst [vmem:[%s4643_s18 + $0x40] sm:$0xff] %v2356_v31  ;;  %v3633_v32 = vpop.f32.mrb[106].mxu1 }
 0x76d   : > { %v2371_v34 = vadd.f32 %v3633_v32, %v4637_v11  ;;  %v2365_v35 = vpop.f32.mrb[107].mxu1 }
 0x76e   : > { %v2366_v36 = vadd.f32 %v4637_v11, %v2365_v35 }
 0x76f   : > { %2485 = vst [vmem:[%s4643_s18 + $0x58] sm:$0xff] %v2371_v34 }
 0x770   : > { %2484 = vst [vmem:[%s4643_s18 + $0x50] sm:$0xff] %v2366_v36  ;;  %v3636_v37 = vpop.f32.mrb[108].mxu1 }
 0x771   : > { %v2381_v38 = vadd.f32 %v3636_v37, %v4637_v11  ;;  %v2375_v39 = vpop.f32.mrb[109].mxu1 }
 0x772   : > { %v2376_v41 = vadd.f32 %v4637_v11, %v2375_v39 }
 0x773   : > { %2487 = vst [vmem:[%s4643_s18 + $0x68] sm:$0xff] %v2381_v38 }
 0x774   : > { %2486 = vst [vmem:[%s4643_s18 + $0x60] sm:$0xff] %v2376_v41  ;;  %v3639_v42 = vpop.f32.mrb[110].mxu1 }
 0x775   : > { %v2391_v43 = vadd.f32 %v3639_v42, %v4637_v11  ;;  %v2385_v45 = vpop.f32.mrb[111].mxu1 }
 0x776   : > { %v2386_v46 = vadd.f32 %v4637_v11, %v2385_v45 }
 0x777   : > { %2489 = vst [vmem:[%s4643_s18 + $0x78] sm:$0xff] %v2391_v43 }
 0x778   : > { %2488 = vst [vmem:[%s4643_s18 + $0x70] sm:$0xff] %v2386_v46  ;;  %v3642_v47 = vpop.f32.mrb[112].mxu1 }
 0x779   : > { %v2401_v48 = vadd.f32 %v3642_v47, %v4637_v11  ;;  %v2395_v49 = vpop.f32.mrb[113].mxu1 }
 0x77a   : > { %v2396_v50 = vadd.f32 %v4637_v11, %v2395_v49 }
 0x77b   : > { %2491 = vst [vmem:[%s4643_s18 + $0x88] sm:$0xff] %v2401_v48 }
 0x77c   : > { %2490 = vst [vmem:[%s4643_s18 + $0x80] sm:$0xff] %v2396_v50  ;;  %v3645_v51 = vpop.f32.mrb[114].mxu1 }
 0x77d   : > { %v2411_v52 = vadd.f32 %v3645_v51, %v4637_v11  ;;  %v2405_v26 = vpop.f32.mrb[115].mxu1 }
 0x77e   : > { %v2406_v53 = vadd.f32 %v4637_v11, %v2405_v26 }
 0x77f   : > { %2493 = vst [vmem:[%s4643_s18 + $0x98] sm:$0xff] %v2411_v52 }
 0x780   : > { %2492 = vst [vmem:[%s4643_s18 + $0x90] sm:$0xff] %v2406_v53  ;;  %v3648_v54 = vpop.f32.mrb[116].mxu1 }
 0x781   : > { %v2421_v55 = vadd.f32 %v3648_v54, %v4637_v11  ;;  %v2415_v56 = vpop.f32.mrb[117].mxu1 }
 0x782   : > { %v2416_v57 = vadd.f32 %v4637_v11, %v2415_v56 }
 0x783   : > { %2495 = vst [vmem:[%s4643_s18 + $0xa8] sm:$0xff] %v2421_v55 }
 0x784   : > { %2494 = vst [vmem:[%s4643_s18 + $0xa0] sm:$0xff] %v2416_v57  ;;  %v3651_v58 = vpop.f32.mrb[118].mxu1 }
 0x785   : > { %v2431_v59 = vadd.f32 %v3651_v58, %v4637_v11  ;;  %v2425_v33 = vpop.f32.mrb[119].mxu1 }
 0x786   : > { %v2426_v60 = vadd.f32 %v4637_v11, %v2425_v33 }
 0x787   : > { %2497 = vst [vmem:[%s4643_s18 + $0xb8] sm:$0xff] %v2431_v59 }
 0x788   : > { %2496 = vst [vmem:[%s4643_s18 + $0xb0] sm:$0xff] %v2426_v60  ;;  %v3654_v61 = vpop.f32.mrb[120].mxu1 }
 0x789   : > { %v2441_v62 = vadd.f32 %v3654_v61, %v4637_v11  ;;  %v2435_v63 = vpop.f32.mrb[121].mxu1 }
 0x78a   : > { %v2436_v0 = vadd.f32 %v4637_v11, %v2435_v63 }
 0x78b   : > { %2499 = vst [vmem:[%s4643_s18 + $0xc8] sm:$0xff] %v2441_v62 }
 0x78c   : > { %2498 = vst [vmem:[%s4643_s18 + $0xc0] sm:$0xff] %v2436_v0  ;;  %v3657_v1 = vpop.f32.mrb[122].mxu1 }
 0x78d   : > { %v2451_v40 = vadd.f32 %v3657_v1, %v4637_v11  ;;  %v2445_v2 = vpop.f32.mrb[123].mxu1 }
 0x78e   : > { %v2446_v3 = vadd.f32 %v4637_v11, %v2445_v2 }
 0x78f   : > { %2501 = vst [vmem:[%s4643_s18 + $0xd8] sm:$0xff] %v2451_v40 }
 0x790   : > { %2500 = vst [vmem:[%s4643_s18 + $0xd0] sm:$0xff] %v2446_v3  ;;  %v3660_v4 = vpop.f32.mrb[124].mxu1 }
 0x791   : > { %v2461_v5 = vadd.f32 %v3660_v4, %v4637_v11  ;;  %v2455_v6 = vpop.f32.mrb[125].mxu1 }
 0x792   : > { %v2456_v7 = vadd.f32 %v4637_v11, %v2455_v6 }
 0x793   : > { %2503 = vst [vmem:[%s4643_s18 + $0xe8] sm:$0xff] %v2461_v5 }
 0x794   : > { %2502 = vst [vmem:[%s4643_s18 + $0xe0] sm:$0xff] %v2456_v7  ;;  %v3663_v8 = vpop.f32.mrb[126].mxu1 }
 0x795   : > { %v2471_v9 = vadd.f32 %v3663_v8, %v4637_v11  ;;  %v2465_v10 = vpop.f32.mrb[127].mxu1 }
 0x796   : > { %v2466_v12 = vadd.f32 %v4637_v11, %v2465_v10 }
 0x797   : > { %2505 = vst [vmem:[%s4643_s18 + $0xf8] sm:$0xff] %v2471_v9 }
 0x798   : > { %2504 = vst [vmem:[%s4643_s18 + $0xf0] sm:$0xff] %v2466_v12 }
 0x799   : > { %4092 = shalt.err (!%p4089_p7)
}
 0x79a   : > { %s4093_s23 = scalar_lea.hbm %s4709_s22, 4096  ;;  %s4097_s28 = scalar_lea.hbm %s4760_s3, 16384 }
 0x79b   : > { %p4094_p9 = scmp.ne.s32.totalorder %s4709_s22, %s4093_s23  ;;  %p4098_p5 = scmp.lt.u32.totalorder %s4709_s22, %s4760_s3 }
 0x79c   : > { %p4099_p10 = scmp.lt.u32.totalorder %s4097_s28, %s4093_s23  ;;  %p4101_p2 = scmp.lt.u32.totalorder %s4093_s23, %s4709_s22 }
 0x79d   : > { %p4095_p12 = pnand %p4094_p9, %p4299_p8 }
 0x79e   : > { %p4100_p1 = por %p4099_p10, %p4098_p5 }
 0x79f   : > { %p4096_p0 = pneg %p4095_p12 }
 0x7a0   : > { %p4102_p4 = por %p4101_p2, %p4100_p1 }
 0x7a2   : > { %p4103_p6 = pnand %p4102_p4, %p4096_p0 }
 0x7a4   : > { %4106 = shalt.err (!%p4103_p6)
}
 0x7a5   : > { %s4159_s29 = smov 128   ;;  %s4160_s18 = smov 8  }
 0x7a6   : > { %3930 = dma.vmem_to_hbm [thread:$0]  (%p4299_p8), %s4711_s7, 4096, %s4709_s22, %s2507_s16, %s4159_s29, %s4159_s29, %s4160_s18  }
 0x7a7 PF: > { %p3952_p11 = scmp.ge.s32.totalorder %s4149_s15, 2  ;;  %s2535_s20 = sand.u32 1, %s4137_s12  }
 0x7a8   : > { %p4775_p13 = scmp.ne.s32.totalorder %s4765_s19, 0  ;;  %s2536_s8 = scalar_lea.sflag [#allocation4], %s2535_s20 }
 0x7aa   : > { %p3944_p3 = pnand %p3952_p11, %p4775_p13 }
 0x7ac   : > { %4132 = dma.done.wait (!%p3944_p3), %s2536_s8, 4096  }
 0x7ad   : > { %4134 = vsyncadd (!%p3944_p3), %s2536_s8, 4294963200  ;;  %p17_p7 = scmp.ge.s32.totalorder %s4286_s6, 6   ;;  %s4776_s12 = smov %s4141_s13 }
 0x7ae   : > { %s4777_s13 = smov %s4145_s14  ;;  %s4778_s14 = smov %s4295_s11 }
 0x7af   : > { %s4779_s15 = smov %s4286_s6  ;;  %19 = sbr.rel (!%p17_p7) target bundleno = 6 (0x6), region = 99 }
 0x7b6   :  { %2541 = vsyncpa [#allocation3], 1 }
 0x7b7   :  { %2543 = vsyncpa [#allocation3 + $0x1], 1 }
 0x7b8   :  { %2544 = vsyncpa [#allocation6], 1 }
 0x7b9   :  { %2545 = vsyncpa [#allocation4], 1 }
 0x7ba   :  { %2547 = vsyncpa [#allocation4 + $0x1], 1 }

</bundles_post_ra>
